<compile_context>
chip_gen: v6e
topology: v6e:2x2x1
jax: 0.10.0
libtpu: 0.0.40
codegen_flags: <defaults>
</compile_context>

<pallas_src>
import jax
import jax.numpy as jnp
from jax.experimental import pallas as pl
from jax.experimental.pallas import tpu as pltpu

# ----- small, TPU-friendly shapes consistent with the module's forward -----
BATCH = 8
STATE_DIM = 64
HIDDEN = 128
ACTION_DIM = 8
PAD = 128                 # lane-dense width for head / action / output slab
T_STEPS = 16              # rollout steps fused into one launch
M_ROWS = T_STEPS * BATCH  # 128 -> full MXU M dimension


def policy_kernel(obs_ref, h10_ref, h20_ref, act_ref, sel_ref,
                  w_ih1_ref, w_hh1_ref, b1_ref,
                  w2a_ref, w2b_ref, b2_ref,
                  wm_ref, bm_ref, inv_std_ref, logp_const_ref,
                  out_ref):
    f32, bf16 = jnp.float32, jnp.bfloat16

    obs = obs_ref[...].astype(bf16)      # (M, S)
    h1_0 = h10_ref[...].astype(bf16)     # (M, H)
    h2_0 = h20_ref[...].astype(bf16)     # (M, H)

    # RNNCell 1: relu(tanh(obs @ Wih1 + h1_0 @ Whh1 + (b_ih1+b_hh1)))
    pre1 = (jnp.dot(obs, w_ih1_ref[...], preferred_element_type=f32)
            + jnp.dot(h1_0, w_hh1_ref[...], preferred_element_type=f32)
            + b1_ref[...])
    h1 = jnp.maximum(jnp.tanh(pre1), 0.0)

    # RNNCell 2: split-weight accumulate (no lane-axis concat).
    pre2 = (jnp.dot(h1.astype(bf16), w2a_ref[...], preferred_element_type=f32)
            + jnp.dot(h2_0, w2b_ref[...], preferred_element_type=f32)
            + b2_ref[...])
    h2 = jnp.maximum(jnp.tanh(pre2), 0.0)

    # mean head; Wm/bm zero-padded to 128 lanes -> mean == 0 for lanes >= A.
    mean = jnp.tanh(jnp.dot(h2.astype(bf16), wm_ref[...],
                            preferred_element_type=f32) + bm_ref[...])   # (M, PAD)

    # Widen action (M, A) -> (M, PAD) with a tiny K=8 selector matmul (keeps
    # everything lane-dense; avoids an unaligned minor-dim concat/pad).
    act_wide = jnp.dot(act_ref[...], sel_ref[...], preferred_element_type=f32)

    # Normal(mean, exp(log_std)).log_prob(action).sum(-1)
    # inv_std = exp(-log_std) on lanes < A and 0 elsewhere -> padded lanes add 0.
    z = (act_wide - mean) * inv_std_ref[...]
    logp = logp_const_ref[0, 0] - 0.5 * jnp.sum(z * z, axis=-1, keepdims=True)

    # Lane-dense output slab: mean in lanes [0, A), logp in lane A.
    lane = jax.lax.broadcasted_iota(jnp.int32, mean.shape, 1)
    out_ref[...] = jnp.where(lane == ACTION_DIM, logp, mean)


def prepare_kernel_params(p):
    """One-time prep (off the per-call hot path): transpose / pad / bf16 cast."""
    A, bf16 = ACTION_DIM, jnp.bfloat16
    w_ih1 = p["w_ih1"].T.astype(bf16)                                   # (S, H)
    w_hh1 = p["w_hh1"].T.astype(bf16)                                   # (H, H)
    b1 = (p["b_ih1"] + p["b_hh1"])[None, :]                             # (1, H) f32
    w2a = p["w_ih2"].T.astype(bf16)                                     # (H, H)
    w2b = p["w_hh2"].T.astype(bf16)                                     # (H, H)
    b2 = (p["b_ih2"] + p["b_hh2"])[None, :]
    wm = (jnp.zeros((HIDDEN, PAD), jnp.float32)
          .at[:, :A].set(p["w_m"].T).astype(bf16))                      # (H, PAD)
    bm = jnp.zeros((1, PAD), jnp.float32).at[0, :A].set(p["b_m"])
    inv_std = jnp.zeros((1, PAD), jnp.float32).at[0, :A].set(jnp.exp(-p["log_std"]))
    sel = jnp.zeros((A, PAD), jnp.float32).at[jnp.arange(A), jnp.arange(A)].set(1.0)
    logp_const = (-jnp.sum(p["log_std"])
                  - 0.5 * A * jnp.log(2.0 * jnp.pi)).reshape(1, 1)
    return dict(w_ih1=w_ih1, w_hh1=w_hh1, b1=b1, w2a=w2a, w2b=w2b, b2=b2,
                wm=wm, bm=bm, inv_std=inv_std, sel=sel, logp_const=logp_const,
                std=jnp.exp(p["log_std"]))


@jax.jit
def play_generation_forward(obs_seq, act_seq, h1_seq, h2_seq, kp):
    """obs_seq: (T,B,S), act_seq: (T,B,A), h*_seq: (T,B,H) random hidden inits.
    Returns (mean (T,B,A), std (A,), logp (T,B))."""
    T, B = obs_seq.shape[0], obs_seq.shape[1]
    M = T * B

    # Free (contiguous) reshapes: flatten rollout x batch into the matmul M dim.
    obs = obs_seq.reshape(M, STATE_DIM)
    act = act_seq.reshape(M, ACTION_DIM)
    h1_0 = h1_seq.reshape(M, HIDDEN)
    h2_0 = h2_seq.reshape(M, HIDDEN)

    vmem = lambda: pl.BlockSpec(memory_space=pltpu.MemorySpace.VMEM)
    smem = pl.BlockSpec(memory_space=pltpu.MemorySpace.SMEM)

    cost = pl.CostEstimate(flops=19_140_000, transcendentals=49_152,
                           bytes_accessed=390_000)

    slab = pl.pallas_call(
        policy_kernel,
        out_shape=jax.ShapeDtypeStruct((M, PAD), jnp.float32),
        in_specs=[vmem() for _ in range(14)] + [smem],
        out_specs=vmem(),
        cost_estimate=cost,
    )(obs, h1_0, h2_0, act, kp["sel"],
      kp["w_ih1"], kp["w_hh1"], kp["b1"],
      kp["w2a"], kp["w2b"], kp["b2"],
      kp["wm"], kp["bm"], kp["inv_std"], kp["logp_const"])

    mean = slab[:, :ACTION_DIM].reshape(T, B, ACTION_DIM)
    logp = slab[:, ACTION_DIM].reshape(T, B)
    return mean, kp["std"], logp


def make_params(key):
    ks = jax.random.split(key, 7)
    s = 0.05
    return {
        "w_ih1": s * jax.random.normal(ks[0], (HIDDEN, STATE_DIM), jnp.float32),
        "b_ih1": s * jax.random.normal(ks[1], (HIDDEN,), jnp.float32),
        "w_hh1": s * jax.random.normal(ks[2], (HIDDEN, HIDDEN), jnp.float32),
        "b_hh1": jnp.zeros((HIDDEN,), jnp.float32),
        "w_ih2": s * jax.random.normal(ks[3], (HIDDEN, HIDDEN), jnp.float32),
        "b_ih2": jnp.zeros((HIDDEN,), jnp.float32),
        "w_hh2": s * jax.random.normal(ks[4], (HIDDEN, HIDDEN), jnp.float32),
        "b_hh2": jnp.zeros((HIDDEN,), jnp.float32),
        "w_m": s * jax.random.normal(ks[5], (ACTION_DIM, HIDDEN), jnp.float32),
        "b_m": s * jax.random.normal(ks[6], (ACTION_DIM,), jnp.float32),
        "log_std": jnp.full((ACTION_DIM,), -0.5, jnp.float32),
    }


def reference_forward(obs_seq, act_seq, h1_seq, h2_seq, p):
    """Pure-JAX f32 reference, mirrors the PyTorch module step-by-step."""
    def step(obs, a, h1_0, h2_0):
        pre1 = obs @ p["w_ih1"].T + p["b_ih1"] + h1_0 @ p["w_hh1"].T + p["b_hh1"]
        h1 = jnp.maximum(jnp.tanh(pre1), 0.0)
        pre2 = h1 @ p["w_ih2"].T + p["b_ih2"] + h2_0 @ p["w_hh2"].T + p["b_hh2"]
        h2 = jnp.maximum(jnp.tanh(pre2), 0.0)
        mean = jnp.tanh(h2 @ p["w_m"].T + p["b_m"])
        std = jnp.exp(p["log_std"])
        z = (a - mean) / std
        logp = jnp.sum(-0.5 * z * z - p["log_std"] - 0.5 * jnp.log(2.0 * jnp.pi), -1)
        return mean, logp
    mean, logp = jax.vmap(step)(obs_seq, act_seq, h1_seq, h2_seq)
    return mean, jnp.exp(p["log_std"]), logp


if __name__ == "__main__":
    key = jax.random.PRNGKey(0)
    k_obs, k_act, k_h1, k_h2, k_param = jax.random.split(key, 5)

    obs_seq = jax.random.normal(k_obs, (T_STEPS, BATCH, STATE_DIM), jnp.float32)
    act_seq = jax.random.normal(k_act, (T_STEPS, BATCH, ACTION_DIM), jnp.float32)
    # torch.randn hidden-state init in _prepare_obs (fresh every forward call)
    # -> deterministic per-step randoms here; steps are therefore independent.
    h1_seq = jax.random.normal(k_h1, (T_STEPS, BATCH, HIDDEN), jnp.float32)
    h2_seq = jax.random.normal(k_h2, (T_STEPS, BATCH, HIDDEN), jnp.float32)

    params = make_params(k_param)
    kparams = prepare_kernel_params(params)   # one-time, off the hot path

    mean, std, logp = jax.block_until_ready(
        play_generation_forward(obs_seq, act_seq, h1_seq, h2_seq, kparams))

    mean_r, std_r, logp_r = reference_forward(obs_seq, act_seq, h1_seq, h2_seq, params)
    # Tolerances loosened for bf16 weights / bf16 MXU operands (f32 accumulate).
    assert jnp.allclose(mean, mean_r, atol=2.5e-2, rtol=1e-2)
    assert jnp.allclose(std, std_r, atol=1e-6, rtol=1e-6)
    assert jnp.allclose(logp, logp_r, atol=3e-1, rtol=2e-2)

    # TODO(synk): policy.sample() in step() (stochastic sampling) is left to the
    # host/JAX side; the kernel returns (mean, std, logp) which fully define Normal.
    print("KERNEL_OK")
</pallas_src>

<mosaic_0001>
module attributes {stable_mosaic.version = 11 : i64} {
  func.func @policy_kernel(%arg0: memref<128x64xf32, #tpu.memory_space<vmem>>, %arg1: memref<128x128xf32, #tpu.memory_space<vmem>>, %arg2: memref<128x128xf32, #tpu.memory_space<vmem>>, %arg3: memref<128x8xf32, #tpu.memory_space<vmem>>, %arg4: memref<8x128xf32, #tpu.memory_space<vmem>>, %arg5: memref<64x128xbf16, #tpu.memory_space<vmem>>, %arg6: memref<128x128xbf16, #tpu.memory_space<vmem>>, %arg7: memref<1x128xf32, #tpu.memory_space<vmem>>, %arg8: memref<128x128xbf16, #tpu.memory_space<vmem>>, %arg9: memref<128x128xbf16, #tpu.memory_space<vmem>>, %arg10: memref<1x128xf32, #tpu.memory_space<vmem>>, %arg11: memref<128x128xbf16, #tpu.memory_space<vmem>>, %arg12: memref<1x128xf32, #tpu.memory_space<vmem>>, %arg13: memref<1x128xf32, #tpu.memory_space<vmem>>, %arg14: memref<1x1xf32, #tpu.memory_space<smem>>, %arg15: memref<128x128xf32, #tpu.memory_space<vmem>>) attributes {dimension_semantics = [], scalar_prefetch = 0 : i64, scratch_operands = 0 : i64, tpu.core_type = #tpu.core_type<tc>} {
    %c0 = arith.constant 0 : index
    %c0_0 = arith.constant 0 : index
    %0 = vector.load %arg0[%c0, %c0_0] : memref<128x64xf32, #tpu.memory_space<vmem>>, vector<128x64xf32>
    %1 = arith.truncf %0 : vector<128x64xf32> to vector<128x64xbf16>
    %c0_1 = arith.constant 0 : index
    %c0_2 = arith.constant 0 : index
    %2 = vector.load %arg1[%c0_1, %c0_2] : memref<128x128xf32, #tpu.memory_space<vmem>>, vector<128x128xf32>
    %3 = arith.truncf %2 : vector<128x128xf32> to vector<128x128xbf16>
    %c0_3 = arith.constant 0 : index
    %c0_4 = arith.constant 0 : index
    %4 = vector.load %arg2[%c0_3, %c0_4] : memref<128x128xf32, #tpu.memory_space<vmem>>, vector<128x128xf32>
    %5 = arith.truncf %4 : vector<128x128xf32> to vector<128x128xbf16>
    %c0_5 = arith.constant 0 : index
    %c0_6 = arith.constant 0 : index
    %6 = vector.load %arg5[%c0_5, %c0_6] : memref<64x128xbf16, #tpu.memory_space<vmem>>, vector<64x128xbf16>
    %cst = arith.constant dense<0.000000e+00> : vector<128x128xf32>
    %7 = tpu.matmul %1, %6, %cst {dimension_numbers = #tpu.dot_dimension_numbers<[1], [0], [0], [1], [0, 0, 1, 1], [], []>} : vector<128x64xbf16>, vector<64x128xbf16>, vector<128x128xf32> -> vector<128x128xf32>
    %c0_7 = arith.constant 0 : index
    %c0_8 = arith.constant 0 : index
    %8 = vector.load %arg6[%c0_7, %c0_8] : memref<128x128xbf16, #tpu.memory_space<vmem>>, vector<128x128xbf16>
    %cst_9 = arith.constant dense<0.000000e+00> : vector<128x128xf32>
    %9 = tpu.matmul %3, %8, %cst_9 {dimension_numbers = #tpu.dot_dimension_numbers<[1], [0], [0], [1], [0, 0, 1, 1], [], []>} : vector<128x128xbf16>, vector<128x128xbf16>, vector<128x128xf32> -> vector<128x128xf32>
    %10 = arith.addf %7, %9 : vector<128x128xf32>
    %c0_10 = arith.constant 0 : index
    %c0_11 = arith.constant 0 : index
    %11 = vector.load %arg7[%c0_10, %c0_11] : memref<1x128xf32, #tpu.memory_space<vmem>>, vector<1x128xf32>
    %12 = vector.broadcast %11 : vector<1x128xf32> to vector<128x128xf32>
    %13 = arith.addf %10, %12 : vector<128x128xf32>
    %14 = math.tanh %13 : vector<128x128xf32>
    %cst_12 = arith.constant 0.000000e+00 : f32
    %15 = vector.broadcast %cst_12 : f32 to vector<128x128xf32>
    %16 = arith.maximumf %14, %15 : vector<128x128xf32>
    %17 = arith.truncf %16 : vector<128x128xf32> to vector<128x128xbf16>
    %c0_13 = arith.constant 0 : index
    %c0_14 = arith.constant 0 : index
    %18 = vector.load %arg8[%c0_13, %c0_14] : memref<128x128xbf16, #tpu.memory_space<vmem>>, vector<128x128xbf16>
    %cst_15 = arith.constant dense<0.000000e+00> : vector<128x128xf32>
    %19 = tpu.matmul %17, %18, %cst_15 {dimension_numbers = #tpu.dot_dimension_numbers<[1], [0], [0], [1], [0, 0, 1, 1], [], []>} : vector<128x128xbf16>, vector<128x128xbf16>, vector<128x128xf32> -> vector<128x128xf32>
    %c0_16 = arith.constant 0 : index
    %c0_17 = arith.constant 0 : index
    %20 = vector.load %arg9[%c0_16, %c0_17] : memref<128x128xbf16, #tpu.memory_space<vmem>>, vector<128x128xbf16>
    %cst_18 = arith.constant dense<0.000000e+00> : vector<128x128xf32>
    %21 = tpu.matmul %5, %20, %cst_18 {dimension_numbers = #tpu.dot_dimension_numbers<[1], [0], [0], [1], [0, 0, 1, 1], [], []>} : vector<128x128xbf16>, vector<128x128xbf16>, vector<128x128xf32> -> vector<128x128xf32>
    %22 = arith.addf %19, %21 : vector<128x128xf32>
    %c0_19 = arith.constant 0 : index
    %c0_20 = arith.constant 0 : index
    %23 = vector.load %arg10[%c0_19, %c0_20] : memref<1x128xf32, #tpu.memory_space<vmem>>, vector<1x128xf32>
    %24 = vector.broadcast %23 : vector<1x128xf32> to vector<128x128xf32>
    %25 = arith.addf %22, %24 : vector<128x128xf32>
    %26 = math.tanh %25 : vector<128x128xf32>
    %cst_21 = arith.constant 0.000000e+00 : f32
    %27 = vector.broadcast %cst_21 : f32 to vector<128x128xf32>
    %28 = arith.maximumf %26, %27 : vector<128x128xf32>
    %29 = arith.truncf %28 : vector<128x128xf32> to vector<128x128xbf16>
    %c0_22 = arith.constant 0 : index
    %c0_23 = arith.constant 0 : index
    %30 = vector.load %arg11[%c0_22, %c0_23] : memref<128x128xbf16, #tpu.memory_space<vmem>>, vector<128x128xbf16>
    %cst_24 = arith.constant dense<0.000000e+00> : vector<128x128xf32>
    %31 = tpu.matmul %29, %30, %cst_24 {dimension_numbers = #tpu.dot_dimension_numbers<[1], [0], [0], [1], [0, 0, 1, 1], [], []>} : vector<128x128xbf16>, vector<128x128xbf16>, vector<128x128xf32> -> vector<128x128xf32>
    %c0_25 = arith.constant 0 : index
    %c0_26 = arith.constant 0 : index
    %32 = vector.load %arg12[%c0_25, %c0_26] : memref<1x128xf32, #tpu.memory_space<vmem>>, vector<1x128xf32>
    %33 = vector.broadcast %32 : vector<1x128xf32> to vector<128x128xf32>
    %34 = arith.addf %31, %33 : vector<128x128xf32>
    %35 = math.tanh %34 : vector<128x128xf32>
    %c0_27 = arith.constant 0 : index
    %c0_28 = arith.constant 0 : index
    %36 = vector.load %arg3[%c0_27, %c0_28] : memref<128x8xf32, #tpu.memory_space<vmem>>, vector<128x8xf32>
    %c0_29 = arith.constant 0 : index
    %c0_30 = arith.constant 0 : index
    %37 = vector.load %arg4[%c0_29, %c0_30] : memref<8x128xf32, #tpu.memory_space<vmem>>, vector<8x128xf32>
    %cst_31 = arith.constant dense<0.000000e+00> : vector<128x128xf32>
    %38 = tpu.matmul %36, %37, %cst_31 {dimension_numbers = #tpu.dot_dimension_numbers<[1], [0], [0], [1], [0, 0, 1, 1], [], []>} : vector<128x8xf32>, vector<8x128xf32>, vector<128x128xf32> -> vector<128x128xf32>
    %39 = arith.subf %38, %35 : vector<128x128xf32>
    %c0_32 = arith.constant 0 : index
    %c0_33 = arith.constant 0 : index
    %40 = vector.load %arg13[%c0_32, %c0_33] : memref<1x128xf32, #tpu.memory_space<vmem>>, vector<1x128xf32>
    %41 = vector.broadcast %40 : vector<1x128xf32> to vector<128x128xf32>
    %42 = arith.mulf %39, %41 : vector<128x128xf32>
    %c0_34 = arith.constant 0 : index
    %c0_35 = arith.constant 0 : index
    %43 = memref.load %arg14[%c0_34, %c0_35] : memref<1x1xf32, #tpu.memory_space<smem>>
    %44 = arith.mulf %42, %42 : vector<128x128xf32>
    %cst_36 = arith.constant dense<0.000000e+00> : vector<128xf32>
    %45 = vector.multi_reduction <add>, %44, %cst_36 [1] : vector<128x128xf32> to vector<128xf32>
    %46 = vector.shape_cast %45 : vector<128xf32> to vector<128x1xf32>
    %cst_37 = arith.constant 5.000000e-01 : f32
    %47 = vector.broadcast %cst_37 : f32 to vector<128x1xf32>
    %48 = arith.mulf %47, %46 : vector<128x1xf32>
    %49 = vector.broadcast %43 : f32 to vector<128x1xf32>
    %50 = arith.subf %49, %48 : vector<128x1xf32>
    %51 = tpu.iota {dimensions = array<i32: 1>} : vector<128x128xi32>
    %c8_i32 = arith.constant 8 : i32
    %52 = vector.broadcast %c8_i32 : i32 to vector<128x128xi32>
    %53 = arith.cmpi eq, %51, %52 : vector<128x128xi32>
    %54 = vector.shape_cast %50 : vector<128x1xf32> to vector<128x1xf32>
    %55 = vector.broadcast %54 : vector<128x1xf32> to vector<128x128xf32>
    %56 = arith.select %53, %55, %35 : vector<128x128xi1>, vector<128x128xf32>
    %c0_38 = arith.constant 0 : index
    %c0_39 = arith.constant 0 : index
    %57 = vector.load %arg15[%c0_38, %c0_39] : memref<128x128xf32, #tpu.memory_space<vmem>>, vector<128x128xf32>
    tpu.vector_store %arg15[%c0_38, %c0_39], %56 {strides = array<i32>} : memref<128x128xf32, #tpu.memory_space<vmem>>, vector<128x128xf32>,
    return
  }
}

</mosaic_0001>

<bundles_post_ra>
// kernel: squeeze.1
= control target key start
LH: loop header
LB: loop body
LE: loop exit
PB: predicated region body
PF: predicated region fallthrough
CT: control target
= control target key end

     0   :  { %s131_s8 = smov 104   ;;  %s132_s9 = smov 112   ;;  %vm8_vm0 = vcmask 64512   ;;  %s222_s0 = inlined_call_operand.vmem [shape: f32[128], index: 0, kind: input, shape index: {}]   ;;  %s223_s1 = inlined_call_operand.vmem [shape: f32[16,8], index: 1, kind: output, shape index: {}]  }
   0x1   :  { %v5_v0 = vld [vmem:[%s222_s0] sm:$0x1]  ;;  %s130_s0 = smov 120   ;;  %s133_s10 = smov 96  }
   0x2   :  { %6 = vst [vmem:[#allocation0] sm:$0x1] %v5_v0  ;;  %s134_s11 = smov 88   ;;  %s135_s12 = smov 80  }
   0x3   :  { %s136_s13 = smov 72   ;;  %s137_s14 = smov 64  }
   0x4   :  { %s138_s17 = smov 56   ;;  %s139_s18 = smov 48  }
   0x5   :  { %s140_s19 = smov 40   ;;  %s141_s20 = smov 32  }
   0x6   :  { %s142_s21 = smov 24   ;;  %s143_s22 = smov 16  }
   0x7   :  { %s144_s23 = smov 8  }
   0x9   :  { %v10_v1 = vld [vmem:[#allocation0] sm:$0x1]  }
   0xa   :  { %v22_v2 = vld [vmem:[#allocation0] sm:$0x1]   ;;  %11 = vrot.lane.b32.xlu0 %v10_v1, %s130_s0 }
   0xb   :  { %23 = vrot.lane.b32.xlu1 %v22_v2, %s131_s8  ;;  %v16_v3 = vld [vmem:[#allocation0] sm:$0x1]  }
   0xc   :  { %v28_v4 = vld [vmem:[#allocation0] sm:$0x1]  }
   0xd   :  { %v34_v5 = vld [vmem:[#allocation0] sm:$0x1]  }
   0xe   :  { %17 = vrot.lane.b32.xlu0 %v16_v3, %s132_s9  ;;  %v40_v6 = vld [vmem:[#allocation0] sm:$0x1]  }
   0xf   :  { %29 = vrot.lane.b32.xlu1 %v28_v4, %s133_s10  ;;  %v46_v7 = vld [vmem:[#allocation0] sm:$0x1]  }
  0x10   :  { %v52_v8 = vld [vmem:[#allocation0] sm:$0x1]  }
  0x11   :  { %v58_v9 = vld [vmem:[#allocation0] sm:$0x1]  }
  0x12   :  { %35 = vrot.lane.b32.xlu0 %v34_v5, %s134_s11  ;;  %v64_v10 = vld [vmem:[#allocation0] sm:$0x1]  }
  0x13   :  { %41 = vrot.lane.b32.xlu1 %v40_v6, %s135_s12  ;;  %v7_v11 = vld [vmem:[#allocation0] sm:$0x1]  }
  0x14   :  { %9 = vst.msk [vmem:[%s223_s1] sm:$0x1] %vm8_vm0, %v7_v11   ;;  %v70_v12 = vld [vmem:[#allocation0] sm:$0x1]  }
  0x15   :  { %v76_v13 = vld [vmem:[#allocation0] sm:$0x1]  }
  0x16   :  { %47 = vrot.lane.b32.xlu0 %v46_v7, %s136_s13  ;;  %v82_v14 = vld [vmem:[#allocation0] sm:$0x1]  }
  0x17   :  { %53 = vrot.lane.b32.xlu1 %v52_v8, %s137_s14  ;;  %v88_v15 = vld [vmem:[#allocation0] sm:$0x1]  }
  0x18   :  { %v94_v16 = vld [vmem:[#allocation0] sm:$0x1]  }
  0x1a   :  { %59 = vrot.lane.b32.xlu0 %v58_v9, %s138_s17 }
  0x1b   :  { %65 = vrot.lane.b32.xlu1 %v64_v10, %s139_s18 }
  0x1e   :  { %71 = vrot.lane.b32.xlu0 %v70_v12, %s140_s19 }
  0x1f   :  { %77 = vrot.lane.b32.xlu1 %v76_v13, %s141_s20 }
  0x22   :  { %83 = vrot.lane.b32.xlu0 %v82_v14, %s142_s21 }
  0x23   :  { %89 = vrot.lane.b32.xlu1 %v88_v15, %s143_s22 }
  0x26   :  { %95 = vrot.lane.b32.xlu0 %v94_v16, %s144_s23 }
  0x7c   :  { %v12_v17 = vpop.permute.xlu0 %11  }
  0x7d   :  { %v24_v18 = vpop.permute.xlu1 %23   ;;  %100 = vst.msk [vmem:[%s223_s1 + $0x1] sm:$0x1] %vm8_vm0, %v12_v17  }
  0x7e   :  { %102 = vst.msk [vmem:[%s223_s1 + $0x3] sm:$0x1] %vm8_vm0, %v24_v18  }
  0x80   :  { %v18_v19 = vpop.permute.xlu0 %17  }
  0x81   :  { %v30_v20 = vpop.permute.xlu1 %29   ;;  %101 = vst.msk [vmem:[%s223_s1 + $0x2] sm:$0x1] %vm8_vm0, %v18_v19  }
  0x82   :  { %103 = vst.msk [vmem:[%s223_s1 + $0x4] sm:$0x1] %vm8_vm0, %v30_v20  }
  0x84   :  { %v36_v21 = vpop.permute.xlu0 %35  }
  0x85   :  { %v42_v22 = vpop.permute.xlu1 %41   ;;  %104 = vst.msk [vmem:[%s223_s1 + $0x5] sm:$0x1] %vm8_vm0, %v36_v21  }
  0x86   :  { %105 = vst.msk [vmem:[%s223_s1 + $0x6] sm:$0x1] %vm8_vm0, %v42_v22  }
  0x88   :  { %v48_v23 = vpop.permute.xlu0 %47  }
  0x89   :  { %v54_v24 = vpop.permute.xlu1 %53   ;;  %106 = vst.msk [vmem:[%s223_s1 + $0x7] sm:$0x1] %vm8_vm0, %v48_v23  }
  0x8a   :  { %107 = vst.msk [vmem:[%s223_s1 + $0x8] sm:$0x1] %vm8_vm0, %v54_v24  }
  0x8c   :  { %v60_v25 = vpop.permute.xlu0 %59  }
  0x8d   :  { %v66_v26 = vpop.permute.xlu1 %65   ;;  %108 = vst.msk [vmem:[%s223_s1 + $0x9] sm:$0x1] %vm8_vm0, %v60_v25  }
  0x8e   :  { %109 = vst.msk [vmem:[%s223_s1 + $0xa] sm:$0x1] %vm8_vm0, %v66_v26  }
  0x90   :  { %v72_v27 = vpop.permute.xlu0 %71  }
  0x91   :  { %v78_v28 = vpop.permute.xlu1 %77   ;;  %110 = vst.msk [vmem:[%s223_s1 + $0xb] sm:$0x1] %vm8_vm0, %v72_v27  }
  0x92   :  { %111 = vst.msk [vmem:[%s223_s1 + $0xc] sm:$0x1] %vm8_vm0, %v78_v28  }
  0x94   :  { %v84_v29 = vpop.permute.xlu0 %83  }
  0x95   :  { %v90_v30 = vpop.permute.xlu1 %89   ;;  %112 = vst.msk [vmem:[%s223_s1 + $0xd] sm:$0x1] %vm8_vm0, %v84_v29  }
  0x96   :  { %113 = vst.msk [vmem:[%s223_s1 + $0xe] sm:$0x1] %vm8_vm0, %v90_v30  }
  0x98   :  { %v96_v31 = vpop.permute.xlu0 %95  }
  0x99   :  { %114 = vst.msk [vmem:[%s223_s1 + $0xf] sm:$0x1] %vm8_vm0, %v96_v31  }

// kernel: play_generation_forward.1
= control target key start
LH: loop header
LB: loop body
LE: loop exit
PB: predicated region body
PF: predicated region fallthrough
CT: control target
= control target key end

     0   :  { %21 = vsyncpa [#allocation4], 0  ;;  %s2678_s0 = inlined_call_operand.vmem [shape: f32[128,64], index: 0, kind: input, shape index: {}]   ;;  %s2679_s1 = inlined_call_operand.hbm [shape: f32[128,128], index: 1, kind: input, shape index: {}]   ;;  %s2680_s2 = inlined_call_operand.hbm [shape: f32[128,128], index: 2, kind: input, shape index: {}]   ;;  %s2681_s3 = inlined_call_operand.vmem [shape: f32[128,8], index: 3, kind: input, shape index: {}]   ;;  %s2682_s4 = inlined_call_operand.vmem [shape: f32[8,128], index: 4, kind: input, shape index: {}]   ;;  %s2683_s5 = inlined_call_operand.hbm [shape: bf16[64,128], index: 5, kind: input, shape index: {}]   ;;  %s2684_s6 = inlined_call_operand.vmem [shape: bf16[128,128], index: 6, kind: input, shape index: {}]   ;;  %s2685_s7 = inlined_call_operand.vmem [shape: f32[1,128], index: 7, kind: input, shape index: {}]   ;;  %s2686_s8 = inlined_call_operand.hbm [shape: bf16[128,128], index: 8, kind: input, shape index: {}]   ;;  %s2687_s9 = inlined_call_operand.hbm [shape: bf16[128,128], index: 9, kind: input, shape index: {}]   ;;  %s2688_s10 = inlined_call_operand.vmem [shape: f32[1,128], index: 10, kind: input, shape index: {}]   ;;  %s2689_s11 = inlined_call_operand.hbm [shape: bf16[128,128], index: 11, kind: input, shape index: {}]   ;;  %s2690_s12 = inlined_call_operand.vmem [shape: f32[1,128], index: 12, kind: input, shape index: {}]   ;;  %s2691_s13 = inlined_call_operand.vmem [shape: f32[1,128], index: 13, kind: input, shape index: {}]   ;;  %s2692_s14 = inlined_call_operand.<no memory space> [shape: f32[1,1], index: 14, kind: input, shape index: {}]   ;;  %s2693_s15 = inlined_call_operand.vmem [shape: f32[128,128], index: 15, kind: output, shape index: {}]  }
   0x1   :  { %22 = vsyncpa [#allocation6], 0 }
   0x2   :  { %23 = vsyncpa [#allocation9], 0 }
   0x3   :  { %24 = vsyncpa [#allocation12], 0  ;;  %s2135_s18 = smov [#allocation5]  }
   0x4   :  { %s44_s19 = sshll.u32 %s2135_s18, 4  ;;  %s45_s19 = int_to_ptr.vmem [resolvable:$true] %s44_s19 }
   0x5   :  { %s2015_s20 = scalar_lea.vmem %s45_s19, 2048  ;;  %p2020_p1 = scmp.lt.s32.totalorder %s45_s19, %s45_s19 }
   0x6   :  { %p2016_p0 = scmp.ne.s32.totalorder %s45_s19, %s2015_s20  ;;  %p2021_p2 = scmp.lt.s32.totalorder %s2015_s20, %s2015_s20 }
   0x8   :  { %p2022_p3 = por %p2021_p2, %p2020_p1 }
   0xa   :  { %p2023_p4 = pnand %p2022_p3, %p2016_p0 }
   0xc   :  { %2026 = shalt.err (!%p2023_p4)
}
   0xd   :  { %s2136_s21 = smov 128   ;;  %s2137_s22 = smov 8  }
   0xe   :  { %50 = dma.hbm_to_vmem [thread:$0]  %s2680_s2, 2048, %s45_s19, [#allocation6], %s2136_s21, %s2136_s21, %s2137_s22  }
   0xf   :  { %s2138_s25 = smov [#allocation8]   ;;  %s2139_s27 = smov [#allocation3]  }
  0x10   :  { %s76_s26 = sshll.u32 %s2138_s25, 4  ;;  %s32_s28 = sshll.u32 %s2139_s27, 4  ;;  %s77_s26 = int_to_ptr.vmem [resolvable:$true] %s76_s26  ;;  %s33_s28 = int_to_ptr.vmem [resolvable:$true] %s32_s28 }
  0x11   :  { %s2035_s29 = scalar_lea.vmem %s77_s26, 1024  ;;  %p2040_p6 = scmp.lt.s32.totalorder %s77_s26, %s77_s26 }
  0x12   :  { %p2036_p5 = scmp.ne.s32.totalorder %s77_s26, %s2035_s29  ;;  %p2041_p7 = scmp.lt.s32.totalorder %s2035_s29, %s2035_s29 }
  0x14   :  { %p2042_p8 = por %p2041_p7, %p2040_p6 }
  0x16   :  { %p2043_p9 = pnand %p2042_p8, %p2036_p5 }
  0x18   :  { %2046 = shalt.err (!%p2043_p9)
}
  0x19   :  { %s2140_s30 = smov 64   ;;  %s2141_s16 = smov 4  }
  0x1a   :  { %82 = dma.hbm_to_vmem [thread:$0]  %s2686_s8, 1024, %s77_s26, [#allocation9], %s2140_s30, %s2140_s30, %s2141_s16  }
  0x1b   :  { %s2055_s2 = scalar_lea.vmem %s33_s28, 2048  ;;  %p2060_p11 = scmp.lt.s32.totalorder %s33_s28, %s33_s28 }
  0x1c   :  { %p2056_p10 = scmp.ne.s32.totalorder %s33_s28, %s2055_s2  ;;  %p2061_p12 = scmp.lt.s32.totalorder %s2055_s2, %s2055_s2 }
  0x1e   :  { %p2062_p13 = por %p2061_p12, %p2060_p11 }
  0x20   :  { %p2063_p0 = pnand %p2062_p13, %p2056_p10 }
  0x22   :  { %2066 = shalt.err (!%p2063_p0)
}
  0x23   :  { %38 = dma.hbm_to_vmem [thread:$0]  %s2679_s1, 2048, %s33_s28, [#allocation4], %s2136_s21, %s2136_s21, %s2137_s22  }
  0x24   :  { %s2142_s23 = smov [#allocation7]   ;;  %s2143_s25 = smov [#allocation10]  }
  0x25   :  { %s60_s24 = sshll.u32 %s2142_s23, 4  ;;  %s88_s27 = sshll.u32 %s2143_s25, 4  ;;  %s61_s24 = int_to_ptr.vmem [resolvable:$true] %s60_s24  ;;  %s89_s27 = int_to_ptr.vmem [resolvable:$true] %s88_s27 }
  0x26   :  { %s2075_s29 = scalar_lea.vmem %s61_s24, 512  ;;  %p2080_p2 = scmp.lt.s32.totalorder %s61_s24, %s61_s24 }
  0x27   :  { %p2076_p1 = scmp.ne.s32.totalorder %s61_s24, %s2075_s29  ;;  %p2081_p3 = scmp.lt.s32.totalorder %s2075_s29, %s2075_s29 }
  0x29   :  { %p2082_p4 = por %p2081_p3, %p2080_p2 }
  0x2b   :  { %p2083_p5 = pnand %p2082_p4, %p2076_p1 }
  0x2d   :  { %2086 = shalt.err (!%p2083_p5)
}
  0x2e   :  { %66 = dma.hbm_to_vmem [thread:$0]  %s2683_s5, 512, %s61_s24, [#allocation6], %s2140_s30, %s2140_s30, %s2141_s16  }
  0x2f   :  { %s2095_s1 = scalar_lea.vmem %s89_s27, 1024  ;;  %p2100_p7 = scmp.lt.s32.totalorder %s89_s27, %s89_s27 }
  0x30   :  { %p2096_p6 = scmp.ne.s32.totalorder %s89_s27, %s2095_s1  ;;  %p2101_p8 = scmp.lt.s32.totalorder %s2095_s1, %s2095_s1 }
  0x32   :  { %p2102_p9 = por %p2101_p8, %p2100_p7 }
  0x34   :  { %p2103_p10 = pnand %p2102_p9, %p2096_p6 }
  0x36   :  { %2106 = shalt.err (!%p2103_p10)
}
  0x37   :  { %94 = dma.hbm_to_vmem [thread:$0]  %s2687_s9, 1024, %s89_s27, [#allocation9], %s2140_s30, %s2140_s30, %s2141_s16  }
  0x38   :  { %s2144_s28 = smov [#allocation11]  }
  0x39   :  { %s102_s17 = sshll.u32 %s2144_s28, 4  ;;  %s103_s17 = int_to_ptr.vmem [resolvable:$true] %s102_s17 }
  0x3a   :  { %s2115_s18 = scalar_lea.vmem %s103_s17, 1024  ;;  %p2120_p12 = scmp.lt.s32.totalorder %s103_s17, %s103_s17 }
  0x3b   :  { %p2116_p11 = scmp.ne.s32.totalorder %s103_s17, %s2115_s18  ;;  %p2121_p13 = scmp.lt.s32.totalorder %s2115_s18, %s2115_s18 }
  0x3d   :  { %p2122_p0 = por %p2121_p13, %p2120_p12 }
  0x3f   :  { %p2123_p1 = pnand %p2122_p0, %p2116_p11 }
  0x41   :  { %2126 = shalt.err (!%p2123_p1)
}
  0x42   :  { %108 = dma.hbm_to_vmem [thread:$0]  %s2689_s11, 1024, %s103_s17, [#allocation12], %s2140_s30, %s2140_s30, %s2141_s16  }
  0x43   :  { %2127 = dma.done.wait [#allocation4], 2048  }
  0x44   :  { %2128 = vsyncadd [#allocation4], 4294965248 }
  0x45   :  { %2129 = dma.done.wait [#allocation6], 2560  }
  0x46   :  { %2130 = vsyncadd [#allocation6], 4294964736 }
  0x47   :  { %2131 = dma.done.wait [#allocation9], 2048  }
  0x48   :  { %2132 = vsyncadd [#allocation9], 4294965248 }
  0x49   :  { %2133 = dma.done.wait [#allocation12], 1024  }
  0x4a   :  { %2134 = vsyncadd [#allocation12], 4294966272  ;;  %v1875_v0 = vld [vmem:[%s2684_s6 + $0x38] sm:$0xff]   ;;  %v1876_v1 = vld [vmem:[%s2684_s6 + $0x30] sm:$0xff]   ;;  %vm399_vm0 = vcmask 523264   ;;  %vm1170_vm1 = vcmask 64512  }
  0x4b   :  { %1685 = vmatprep.subr.bf16.mxu0 %v1875_v0  ;;  %v1878_v2 = vld [vmem:[#allocation7 + $0x18] sm:$0xff]   ;;  %v1877_v3 = vld [vmem:[%s2684_s6 + $0x28] sm:$0xff]   ;;  %v1880_v4 = vld [vmem:[#allocation7 + $0x10] sm:$0xff]  }
  0x4c   :  { %1686 = vmatpush3.bf16.msra.mxu0 %v1875_v0  ;;  %1717 = vmatprep.subr.bf16.mxu1 %v1878_v2  ;;  %v1882_v5 = vld [vmem:[#allocation7 + $0x8] sm:$0xff]   ;;  %v1879_v6 = vld [vmem:[%s2684_s6 + $0x20] sm:$0xff]   ;;  %v1881_v10 = vld [vmem:[%s2684_s6 + $0x18] sm:$0xff]  }
  0x4d   :  { %1687 = vmatprep.subr.bf16.mxu0 %v1876_v1  ;;  %1718 = vmatpush3.bf16.msra.mxu1 %v1878_v2  ;;  %v1884_v7 = vld [vmem:[#allocation7] sm:$0xff]   ;;  %v135_v9 = vld [vmem:[%s2678_s0 + $0x8] sm:$0xff]  ;;  %v136_v14 = vld [vmem:[%s2678_s0 + $0x10] sm:$0xff] }
  0x4e   :  { %1719 = vmatprep.subr.bf16.mxu1 %v1880_v4  ;;  %v134_v8 = vld [vmem:[%s2678_s0] sm:$0xff]  ;;  %v159_v13 = vld [vmem:[#allocation3 + $0x8] sm:$0xff]  ;;  %v137_v15 = vld [vmem:[%s2678_s0 + $0x18] sm:$0xff] }
  0x4f   :  { %v150_v11 = vpack.c.bf16 %v135_v9, %v134_v8  ;;  %v158_v12 = vld [vmem:[#allocation3] sm:$0xff]  ;;  %v139_v18 = vld [vmem:[%s2678_s0 + $0x28] sm:$0xff]  ;;  %v1883_v19 = vld [vmem:[%s2684_s6 + $0x10] sm:$0xff]   ;;  %v151_v20 = vpack.c.bf16 %v137_v15, %v136_v14 }
  0x50   :  { %1688 = vmatpush3.bf16.msra.mxu0 %v1876_v1  ;;  %v174_v16 = vpack.c.bf16 %v159_v13, %v158_v12  ;;  %v138_v17 = vld [vmem:[%s2678_s0 + $0x20] sm:$0xff]  ;;  %v1885_v22 = vld [vmem:[%s2684_s6 + $0x8] sm:$0xff]   ;;  %v140_v23 = vld [vmem:[%s2678_s0 + $0x30] sm:$0xff] }
  0x51   :  { %1689 = vmatprep.subr.bf16.mxu0 %v1877_v3  ;;  %1720 = vmatpush3.bf16.msra.mxu1 %v1880_v4  ;;  %v152_v21 = vpack.c.bf16 %v139_v18, %v138_v17  ;;  %v141_v24 = vld [vmem:[%s2678_s0 + $0x38] sm:$0xff]  ;;  %v1886_v25 = vld [vmem:[%s2684_s6] sm:$0xff]   ;;  %v143_v27 = vld [vmem:[%s2678_s0 + $0x48] sm:$0xff] }
  0x52   :  { %1721 = vmatprep.subr.bf16.mxu1 %v1882_v5  ;;  %1725 = vmatprep.mubr.msk.bf16.mxu1 %vm399_vm0, %v150_v11  ;;  %v142_v26 = vld [vmem:[%s2678_s0 + $0x40] sm:$0xff]  ;;  %v1887_v28 = vld [vmem:[#allocation10 + $0x38] sm:$0xff]   ;;  %v160_v29 = vld [vmem:[#allocation3 + $0x10] sm:$0xff]  ;;  %v153_v31 = vpack.c.bf16 %v141_v24, %v140_v23 }
  0x53   :  { %1701 = vmatprep.mubr.bf16.mxu0 %v174_v16  ;;  %v161_v30 = vld [vmem:[#allocation3 + $0x18] sm:$0xff]  ;;  %v162_v32 = vld [vmem:[#allocation3 + $0x20] sm:$0xff]  ;;  %v163_v33 = vld [vmem:[#allocation3 + $0x28] sm:$0xff]  ;;  %v154_v34 = vpack.c.bf16 %v143_v27, %v142_v26 }
  0x54   :  { %1690 = vmatpush3.bf16.msra.mxu0 %v1877_v3  ;;  %v144_v35 = vld [vmem:[%s2678_s0 + $0x50] sm:$0xff]  ;;  %v145_v36 = vld [vmem:[%s2678_s0 + $0x58] sm:$0xff]  ;;  %v146_v37 = vld [vmem:[%s2678_s0 + $0x60] sm:$0xff]  ;;  %v175_v39 = vpack.c.bf16 %v161_v30, %v160_v29  ;;  %v176_v40 = vpack.c.bf16 %v163_v33, %v162_v32 }
  0x55   :  { %1691 = vmatprep.subr.bf16.mxu0 %v1879_v6  ;;  %1722 = vmatpush3.bf16.msra.mxu1 %v1882_v5  ;;  %v147_v38 = vld [vmem:[%s2678_s0 + $0x68] sm:$0xff]  ;;  %v164_v41 = vld [vmem:[#allocation3 + $0x30] sm:$0xff]  ;;  %v165_v42 = vld [vmem:[#allocation3 + $0x38] sm:$0xff]  ;;  %v155_v43 = vpack.c.bf16 %v145_v36, %v144_v35 }
  0x56   :  { %1723 = vmatprep.subr.bf16.mxu1 %v1884_v7  ;;  %v166_v44 = vld [vmem:[#allocation3 + $0x40] sm:$0xff]  ;;  %v167_v45 = vld [vmem:[#allocation3 + $0x48] sm:$0xff]  ;;  %v156_v46 = vpack.c.bf16 %v147_v38, %v146_v37  ;;  %v148_v47 = vld [vmem:[%s2678_s0 + $0x70] sm:$0xff]  ;;  %v177_v49 = vpack.c.bf16 %v165_v42, %v164_v41 }
  0x57   :  { %v149_v48 = vld [vmem:[%s2678_s0 + $0x78] sm:$0xff]  ;;  %v178_v50 = vpack.c.bf16 %v167_v45, %v166_v44  ;;  %v168_v52 = vld [vmem:[#allocation3 + $0x50] sm:$0xff]  ;;  %v170_v54 = vld [vmem:[#allocation3 + $0x60] sm:$0xff] }
  0x58   :  { %1692 = vmatpush3.bf16.msra.mxu0 %v1879_v6  ;;  %v157_v51 = vpack.c.bf16 %v149_v48, %v148_v47  ;;  %v169_v53 = vld [vmem:[#allocation3 + $0x58] sm:$0xff]  ;;  %v171_v55 = vld [vmem:[#allocation3 + $0x68] sm:$0xff]  ;;  %v172_v58 = vld [vmem:[#allocation3 + $0x70] sm:$0xff] }
  0x59   :  { %1693 = vmatprep.subr.bf16.mxu0 %v1881_v10  ;;  %1724 = vmatpush3.bf16.msra.mxu1 %v1884_v7  ;;  %v179_v56 = vpack.c.bf16 %v169_v53, %v168_v52  ;;  %v180_v57 = vpack.c.bf16 %v171_v55, %v170_v54  ;;  %v173_v59 = vld [vmem:[#allocation3 + $0x78] sm:$0xff]  ;;  %v1888_v61 = vld [vmem:[#allocation10 + $0x30] sm:$0xff]   ;;  %v1890_v63 = vld [vmem:[#allocation10 + $0x28] sm:$0xff]  }
  0x5a   :  { %1741 = vmatprep.subr.bf16.mxu1 %v1887_v28  ;;  %v181_v60 = vpack.c.bf16 %v173_v59, %v172_v58  ;;  %v1889_v62 = vld [vmem:[#allocation8 + $0x38] sm:$0xff]   ;;  %v1891_v0 = vld [vmem:[#allocation8 + $0x30] sm:$0xff]   ;;  %v1892_v1 = vld [vmem:[#allocation10 + $0x20] sm:$0xff]  }
  0x5b   :  { %v1893_v2 = vld [vmem:[#allocation8 + $0x28] sm:$0xff]   ;;  %v1894_v3 = vld [vmem:[#allocation10 + $0x18] sm:$0xff]   ;;  %v1895_v4 = vld [vmem:[#allocation8 + $0x20] sm:$0xff]  }
  0x5c   :  { %1694 = vmatpush3.bf16.msra.mxu0 %v1881_v10  ;;  %1726 = vmatmul.mubr.msk.bf16.vlgmr.msra.gmra.mxu1 %vm399_vm0, %v151_v20  ;;  %v1896_v5 = vld [vmem:[#allocation10 + $0x10] sm:$0xff]   ;;  %v1897_v6 = vld [vmem:[#allocation8 + $0x18] sm:$0xff]   ;;  %v1898_v7 = vld [vmem:[#allocation10 + $0x8] sm:$0xff]  }
  0x5d   :  { %1695 = vmatprep.subr.bf16.mxu0 %v1883_v19  ;;  %1729 = vmatprep.mubr.msk.bf16.mxu1 %vm399_vm0, %v152_v21  ;;  %v1899_v8 = vld [vmem:[#allocation8 + $0x10] sm:$0xff]   ;;  %v1900_v9 = vld [vmem:[#allocation10] sm:$0xff]   ;;  %v1901_v10 = vld [vmem:[#allocation8 + $0x8] sm:$0xff]  }
  0x5e   :  { %1742 = vmatpush3.bf16.msra.mxu1 %v1887_v28  ;;  %v182_v11 = vld [vmem:[#allocation5] sm:$0xff]  ;;  %v183_v12 = vld [vmem:[#allocation5 + $0x8] sm:$0xff]  ;;  %v184_v14 = vld [vmem:[#allocation5 + $0x10] sm:$0xff] }
  0x5f   :  { %1743 = vmatprep.subr.bf16.mxu1 %v1888_v61  ;;  %v198_v13 = vpack.c.bf16 %v183_v12, %v182_v11  ;;  %v185_v15 = vld [vmem:[#allocation5 + $0x18] sm:$0xff]  ;;  %v1902_v17 = vld [vmem:[#allocation8] sm:$0xff]   ;;  %v188_v21 = vld [vmem:[#allocation5 + $0x30] sm:$0xff] }
  0x60   :  { %1696 = vmatpush3.bf16.msra.mxu0 %v1883_v19  ;;  %v199_v16 = vpack.c.bf16 %v185_v15, %v184_v14  ;;  %v186_v18 = vld [vmem:[#allocation5 + $0x20] sm:$0xff]  ;;  %v187_v19 = vld [vmem:[#allocation5 + $0x28] sm:$0xff]  ;;  %v192_v27 = vld [vmem:[#allocation5 + $0x50] sm:$0xff] }
  0x61   :  { %1697 = vmatprep.subr.bf16.mxu0 %v1885_v22  ;;  %v200_v20 = vpack.c.bf16 %v187_v19, %v186_v18  ;;  %v190_v24 = vld [vmem:[#allocation5 + $0x40] sm:$0xff]  ;;  %v193_v28 = vld [vmem:[#allocation5 + $0x58] sm:$0xff]  ;;  %v196_v33 = vld [vmem:[#allocation5 + $0x70] sm:$0xff] }
  0x62   :  { %1744 = vmatpush3.bf16.msra.mxu1 %v1888_v61  ;;  %v203_v29 = vpack.c.bf16 %v193_v28, %v192_v27  ;;  %v194_v30 = vld [vmem:[#allocation5 + $0x60] sm:$0xff]  ;;  %v1903_v36 = vld [vmem:[#allocation11 + $0x38] sm:$0xff]  }
  0x63   :  { %1745 = vmatprep.subr.bf16.mxu1 %v1890_v63 }
  0x64   :  { %1698 = vmatpush3.bf16.msra.mxu0 %v1885_v22  ;;  %1730 = vmatmul.mubr.msk.bf16.gmra.mxu1 %vm399_vm0, %v153_v31  ;;  %v189_v22 = vld [vmem:[#allocation5 + $0x38] sm:$0xff]  ;;  %v195_v31 = vld [vmem:[#allocation5 + $0x68] sm:$0xff] }
  0x65   :  { %1699 = vmatprep.subr.bf16.mxu0 %v1886_v25  ;;  %1733 = vmatprep.mubr.msk.bf16.mxu1 %vm399_vm0, %v154_v34  ;;  %v201_v23 = vpack.c.bf16 %v189_v22, %v188_v21  ;;  %v204_v32 = vpack.c.bf16 %v195_v31, %v194_v30  ;;  %v197_v34 = vld [vmem:[#allocation5 + $0x78] sm:$0xff] }
  0x66   :  { %1746 = vmatpush3.bf16.msra.mxu1 %v1890_v63  ;;  %v205_v35 = vpack.c.bf16 %v197_v34, %v196_v33 }
  0x67   :  { %1747 = vmatprep.subr.bf16.mxu1 %v1892_v1 }
  0x68   :  { %1700 = vmatpush3.bf16.msra.mxu0 %v1886_v25  ;;  %v191_v25 = vld [vmem:[#allocation5 + $0x48] sm:$0xff] }
  0x69   :  { %1773 = vmatprep.subr.bf16.mxu0 %v1889_v62  ;;  %v202_v26 = vpack.c.bf16 %v191_v25, %v190_v24 }
  0x6a   :  { %1748 = vmatpush3.bf16.msra.mxu1 %v1892_v1 }
  0x6b   :  { %1702 = vmatmul.mubr.bf16.vlgmr.msra.gmra.mxu0 %v175_v39  ;;  %1749 = vmatprep.subr.bf16.mxu1 %v1894_v3 }
  0x6c   :  { %1705 = vmatprep.mubr.bf16.mxu0 %v176_v40  ;;  %1734 = vmatmul.mubr.msk.bf16.gmra.mxu1 %vm399_vm0, %v155_v43 }
  0x6d   :  { %1737 = vmatprep.mubr.msk.bf16.mxu1 %vm399_vm0, %v156_v46  ;;  %1774 = vmatpush3.bf16.msra.mxu0 %v1889_v62  ;;  %v2338_v46 = vld [vmem:[%s2685_s7] ss:$0 sm:$0xff] }
  0x6e   :  { %1775 = vmatprep.subr.bf16.mxu0 %v1891_v0  ;;  %1750 = vmatpush3.bf16.msra.mxu1 %v1894_v3 }
  0x6f   :  { %1751 = vmatprep.subr.bf16.mxu1 %v1896_v5 }
  0x71   :  { %1776 = vmatpush3.bf16.msra.mxu0 %v1891_v0 }
  0x72   :  { %1777 = vmatprep.subr.bf16.mxu0 %v1893_v2  ;;  %1752 = vmatpush3.bf16.msra.mxu1 %v1896_v5 }
  0x73   :  { %1706 = vmatmul.mubr.bf16.gmra.mxu0 %v177_v49  ;;  %1753 = vmatprep.subr.bf16.mxu1 %v1898_v7 }
  0x74   :  { %1709 = vmatprep.mubr.bf16.mxu0 %v178_v50  ;;  %1738 = vmatmul.mubr.msk.bf16.gmra.mxu1 %vm399_vm0, %v157_v51 }
  0x75   :  { %1778 = vmatpush3.bf16.msra.mxu0 %v1893_v2  ;;  %1757 = vmatprep.mubr.bf16.mxu1 %v198_v13 }
  0x76   :  { %1779 = vmatprep.subr.bf16.mxu0 %v1895_v4  ;;  %1754 = vmatpush3.bf16.msra.mxu1 %v1898_v7 }
  0x77   :  { %1755 = vmatprep.subr.bf16.mxu1 %v1900_v9 }
  0x79   :  { %1780 = vmatpush3.bf16.msra.mxu0 %v1895_v4 }
  0x7a   :  { %1781 = vmatprep.subr.bf16.mxu0 %v1897_v6  ;;  %1756 = vmatpush3.bf16.msra.mxu1 %v1900_v9 }
  0x7b   :  { %1710 = vmatmul.mubr.bf16.gmra.mxu0 %v179_v56  ;;  %1805 = vmatprep.subr.bf16.mxu1 %v1903_v36 }
  0x7c   :  { %1713 = vmatprep.mubr.bf16.mxu0 %v180_v57 }
  0x7d   :  { %1782 = vmatpush3.bf16.msra.mxu0 %v1897_v6  ;;  %1758 = vmatmul.mubr.bf16.vlgmr.msra.gmra.mxu1 %v199_v16 }
  0x7e   :  { %1783 = vmatprep.subr.bf16.mxu0 %v1899_v8  ;;  %1761 = vmatprep.mubr.bf16.mxu1 %v200_v20 }
  0x7f   :  { %1806 = vmatpush3.bf16.msra.mxu1 %v1903_v36 }
  0x81   :  { %1784 = vmatpush3.bf16.msra.mxu0 %v1899_v8 }
  0x82   :  { %1785 = vmatprep.subr.bf16.mxu0 %v1901_v10 }
  0x83   :  { %1714 = vmatmul.mubr.bf16.gmra.mxu0 %v181_v60 }
  0x85   :  { %1786 = vmatpush3.bf16.msra.mxu0 %v1901_v10  ;;  %1762 = vmatmul.mubr.bf16.gmra.mxu1 %v201_v23 }
  0x86   :  { %1787 = vmatprep.subr.bf16.mxu0 %v1902_v17  ;;  %1765 = vmatprep.mubr.bf16.mxu1 %v202_v26 }
  0x89   :  { %1788 = vmatpush3.bf16.msra.mxu0 %v1902_v17 }
  0x8d   :  { %1766 = vmatmul.mubr.bf16.gmra.mxu1 %v203_v29 }
  0x8e   :  { %1769 = vmatprep.mubr.bf16.mxu1 %v204_v32 }
  0x95   :  { %1770 = vmatmul.mubr.bf16.gmra.mxu1 %v205_v35 }
 0x11c   :  { %v1727_v37 = vpop.f32.mrf.mxu1 }
 0x11e   :  { %v458_v38 = vpop.f32.mrf.mxu1 }
 0x120   :  { %v1728_v39 = vpop.f32.mrf.mxu1 }
 0x122   :  { %v461_v40 = vpop.f32.mrf.mxu1 }
 0x124   :  { %v1731_v41 = vpop.f32.mrf.mxu1 }
 0x126   :  { %v474_v42 = vpop.f32.mrf.mxu1 }
 0x128   :  { %v1732_v43 = vpop.f32.mrf.mxu1 }
 0x12a   :  { %v477_v47 = vpop.f32.mrf.mxu1 }
 0x12b   :  { %v1703_v44 = vpop.f32.mrf.mxu0 }
 0x12c   :  { %v467_v45 = vadd.f32 %v1727_v37, %v1703_v44  ;;  %v1735_v50 = vpop.f32.mrf.mxu1 }
 0x12d   :  { %v312_v48 = vpop.f32.mrf.mxu0 }
 0x12e   :  { %v459_v49 = vadd.f32 %v458_v38, %v312_v48  ;;  %v530_v51 = vadd.f32 %v2338_v46, %v467_v45  ;;  %v490_v56 = vpop.f32.mrf.mxu1 }
 0x12f   :  { %v1704_v52 = vpop.f32.mrf.mxu0 }
 0x130   :  { %v470_v53 = vadd.f32 %v1728_v39, %v1704_v52  ;;  %v528_v54 = vadd.f32 %v2338_v46, %v459_v49  ;;  %1911 = vtanh.f32 %v530_v51  ;;  %v1736_v63 = vpop.f32.mrf.mxu1 }
 0x131   :  { %v315_v55 = vpop.f32.mrf.mxu0 }
 0x132   :  { %v531_v57 = vadd.f32 %v2338_v46, %v470_v53  ;;  %v462_v58 = vadd.f32 %v461_v40, %v315_v55  ;;  %v493_v6 = vpop.f32.mrf.mxu1 }
 0x133   :  { %v1707_v59 = vpop.f32.mrf.mxu0 }
 0x134   :  { %1913 = vtanh.f32 %v531_v57  ;;  %v529_v60 = vadd.f32 %v2338_v46, %v462_v58  ;;  %v483_v61 = vadd.f32 %v1731_v41, %v1707_v59  ;;  %v1739_v13 = vpop.f32.mrf.mxu1 }
 0x135   :  { %1915 = vtanh.f32 %v528_v54  ;;  %v328_v62 = vpop.f32.mrf.mxu0 }
 0x136   :  { %1917 = vtanh.f32 %v529_v60  ;;  %v475_v0 = vadd.f32 %v474_v42, %v328_v62  ;;  %v534_v4 = vadd.f32 %v2338_v46, %v483_v61  ;;  %v506_v21 = vpop.f32.mrf.mxu1 }
 0x137   :  { %v1708_v1 = vpop.f32.mrf.mxu0 }
 0x138   :  { %v532_v2 = vadd.f32 %v2338_v46, %v475_v0  ;;  %v486_v3 = vadd.f32 %v1732_v43, %v1708_v1  ;;  %v1740_v30 = vpop.f32.mrf.mxu1 }
 0x139   :  { %v331_v5 = vpop.f32.mrf.mxu0 }
 0x13a   :  { %v535_v7 = vadd.f32 %v2338_v46, %v486_v3  ;;  %v478_v8 = vadd.f32 %v477_v47, %v331_v5  ;;  %1919 = vtanh.f32 %v532_v2  ;;  %v509_v45 = vpop.f32.mrf.mxu1 }
 0x13b   :  { %v1711_v9 = vpop.f32.mrf.mxu0 }
 0x13c   :  { %1921 = vtanh.f32 %v535_v7  ;;  %v533_v10 = vadd.f32 %v2338_v46, %v478_v8  ;;  %v499_v11 = vadd.f32 %v1735_v50, %v1711_v9 }
 0x13d   :  { %1923 = vtanh.f32 %v534_v4  ;;  %v344_v12 = vpop.f32.mrf.mxu0  ;;  %v1912_v16 = vpop.eup %1911 }
 0x13e   :  { %1925 = vtanh.f32 %v533_v10  ;;  %v491_v14 = vadd.f32 %v490_v56, %v344_v12  ;;  %v538_v20 = vadd.f32 %v2338_v46, %v499_v11  ;;  %v562_v35 = vmax.f32 %v1912_v16, 0.0  ;;  %v1906_v16 = vld [vmem:[#allocation11 + $0x20] sm:$0xff]  }
 0x13f   :  { %v1712_v15 = vpop.f32.mrf.mxu0 }
 0x140   :  { %v536_v17 = vadd.f32 %v2338_v46, %v491_v14  ;;  %v502_v18 = vadd.f32 %v1736_v63, %v1712_v15  ;;  %v1904_v14 = vld [vmem:[#allocation11 + $0x30] sm:$0xff]   ;;  %v1905_v15 = vld [vmem:[#allocation11 + $0x28] sm:$0xff]  }
 0x141   :  { %v1914_v19 = vpop.eup %1913  ;;  %v347_v22 = vpop.f32.mrf.mxu0  ;;  %1807 = vmatprep.subr.bf16.mxu1 %v1904_v14 }
 0x142   :  { %v1916_v23 = vpop.eup %1915  ;;  %v539_v24 = vadd.f32 %v2338_v46, %v502_v18  ;;  %v494_v25 = vadd.f32 %v493_v6, %v347_v22  ;;  %1927 = vtanh.f32 %v536_v17  ;;  %v563_v28 = vmax.f32 %v1914_v19, 0.0  ;;  %1808 = vmatpush3.bf16.msra.mxu1 %v1904_v14  ;;  %v1907_v17 = vld [vmem:[#allocation11 + $0x18] sm:$0xff]   ;;  %v1908_v18 = vld [vmem:[#allocation11 + $0x10] sm:$0xff]   ;;  %v1909_v19 = vld [vmem:[#allocation11 + $0x8] sm:$0xff]  }
 0x143   :  { %v1918_v26 = vpop.eup %1917  ;;  %v1715_v27 = vpop.f32.mrf.mxu0  ;;  %v560_v33 = vmax.f32 %v1916_v23, 0.0  ;;  %1809 = vmatprep.subr.bf16.mxu1 %v1905_v15  ;;  %v1153_v22 = vld [vmem:[%s2681_s3] sm:$0xff]  ;;  %v1154_v23 = vld [vmem:[%s2681_s3 + $0x8] sm:$0xff] }
 0x144   :  { %1929 = vtanh.f32 %v539_v24  ;;  %v537_v29 = vadd.f32 %v2338_v46, %v494_v25  ;;  %v515_v31 = vadd.f32 %v1739_v13, %v1715_v27  ;;  %v561_v34 = vmax.f32 %v1918_v26, 0.0  ;;  %v1155_v24 = vld [vmem:[%s2681_s3 + $0x10] sm:$0xff]  ;;  %v1156_v25 = vld [vmem:[%s2681_s3 + $0x18] sm:$0xff]  ;;  %v1157_v26 = vld [vmem:[%s2681_s3 + $0x20] sm:$0xff] }
 0x145   :  { %1931 = vtanh.f32 %v538_v20  ;;  %v360_v32 = vpop.f32.mrf.mxu0  ;;  %v577_v40 = vpack.c.bf16 %v563_v28, %v562_v35  ;;  %v1910_v20 = vld [vmem:[#allocation11] sm:$0xff]   ;;  %v1158_v27 = vld [vmem:[%s2681_s3 + $0x28] sm:$0xff]  ;;  %v1159_v28 = vld [vmem:[%s2681_s3 + $0x30] sm:$0xff] }
 0x146   :  { %1933 = vtanh.f32 %v537_v29  ;;  %v507_v36 = vadd.f32 %v506_v21, %v360_v32  ;;  %v576_v38 = vpack.c.bf16 %v561_v34, %v560_v33  ;;  %v542_v44 = vadd.f32 %v2338_v46, %v515_v31  ;;  %1810 = vmatpush3.bf16.msra.mxu1 %v1905_v15  ;;  %v2359_v21 = vld [vmem:[%s2682_s4] sm:$0xff]  ;;  %v1160_v29 = vld [vmem:[%s2681_s3 + $0x38] sm:$0xff]  ;;  %v1162_v31 = vld [vmem:[%s2681_s3 + $0x48] sm:$0xff]  ;;  %v1759_v34 = vpop.f32.mrf.mxu1 }
 0x147   :  { %v1716_v37 = vpop.f32.mrf.mxu0  ;;  %v1920_v39 = vpop.eup %1919  ;;  %1811 = vmatprep.subr.bf16.mxu1 %v1906_v16  ;;  %1837 = vmatprep.subr.mxu0 %v2359_v21  ;;  %v1163_v32 = vld [vmem:[%s2681_s3 + $0x50] sm:$0xff]  ;;  %v1164_v33 = vld [vmem:[%s2681_s3 + $0x58] sm:$0xff] }
 0x148   :  { %v540_v41 = vadd.f32 %v2338_v46, %v507_v36  ;;  %v518_v42 = vadd.f32 %v1740_v30, %v1716_v37  ;;  %1789 = vmatprep.mubr.bf16.mxu0 %v576_v38  ;;  %v564_v52 = vmax.f32 %v1920_v39, 0.0  ;;  %v1161_v30 = vld [vmem:[%s2681_s3 + $0x40] sm:$0xff]  ;;  %v698_v35 = vpop.f32.mrf.mxu1 }
 0x149   :  { %v1922_v43 = vpop.eup %1921  ;;  %v363_v47 = vpop.f32.mrf.mxu0  ;;  %1790 = vmatmul.mubr.bf16.vlgmr.msra.gmra.mxu0 %v577_v40 }
 0x14a   :  { %v1924_v48 = vpop.eup %1923  ;;  %v543_v49 = vadd.f32 %v2338_v46, %v518_v42  ;;  %v510_v50 = vadd.f32 %v509_v45, %v363_v47  ;;  %1935 = vtanh.f32 %v540_v41  ;;  %v567_v55 = vmax.f32 %v1922_v43, 0.0  ;;  %1812 = vmatpush3.bf16.msra.mxu1 %v1906_v16  ;;  %1838 = vmatpush3.msra.mxu0 %v2359_v21  ;;  %v1760_v36 = vpop.f32.mrf.mxu1 }
 0x14b   :  { %v1926_v51 = vpop.eup %1925  ;;  %v566_v57 = vmax.f32 %v1924_v48, 0.0  ;;  %1813 = vmatprep.subr.bf16.mxu1 %v1907_v17 }
 0x14c   :  { %1937 = vtanh.f32 %v543_v49  ;;  %v541_v53 = vadd.f32 %v2338_v46, %v510_v50  ;;  %v565_v54 = vmax.f32 %v1926_v51, 0.0  ;;  %v701_v37 = vpop.f32.mrf.mxu1 }
 0x14d   :  { %1939 = vtanh.f32 %v542_v44  ;;  %v579_v59 = vpack.c.bf16 %v567_v55, %v566_v57  ;;  %v2415_v44 = vld [vmem:[%s2688_s10] ss:$0 sm:$0xff] }
 0x14e   :  { %1941 = vtanh.f32 %v541_v53  ;;  %v578_v56 = vpack.c.bf16 %v565_v54, %v564_v52  ;;  %1814 = vmatpush3.bf16.msra.mxu1 %v1907_v17  ;;  %v1763_v38 = vpop.f32.mrf.mxu1 }
 0x14f   :  { %v1928_v58 = vpop.eup %1927  ;;  %1815 = vmatprep.subr.bf16.mxu1 %v1908_v18 }
 0x150   :  { %1793 = vmatprep.mubr.bf16.mxu0 %v578_v56  ;;  %v568_v63 = vmax.f32 %v1928_v58, 0.0  ;;  %v714_v39 = vpop.f32.mrf.mxu1 }
 0x151   :  { %v1930_v60 = vpop.eup %1929  ;;  %1794 = vmatmul.mubr.bf16.gmra.mxu0 %v579_v59 }
 0x152   :  { %v1932_v61 = vpop.eup %1931  ;;  %v571_v1 = vmax.f32 %v1930_v60, 0.0  ;;  %1816 = vmatpush3.bf16.msra.mxu1 %v1908_v18  ;;  %v1764_v40 = vpop.f32.mrf.mxu1 }
 0x153   :  { %v1934_v62 = vpop.eup %1933  ;;  %v570_v3 = vmax.f32 %v1932_v61, 0.0  ;;  %1817 = vmatprep.subr.bf16.mxu1 %v1909_v19 }
 0x154   :  { %v569_v0 = vmax.f32 %v1934_v62, 0.0  ;;  %v717_v41 = vpop.f32.mrf.mxu1 }
 0x155   :  { %v581_v46 = vpack.c.bf16 %v571_v1, %v570_v3 }
 0x156   :  { %v580_v2 = vpack.c.bf16 %v569_v0, %v568_v63  ;;  %1818 = vmatpush3.bf16.msra.mxu1 %v1909_v19  ;;  %v1767_v47 = vpop.f32.mrf.mxu1 }
 0x157   :  { %v1936_v4 = vpop.eup %1935  ;;  %1819 = vmatprep.subr.bf16.mxu1 %v1910_v20 }
 0x158   :  { %1797 = vmatprep.mubr.bf16.mxu0 %v580_v2  ;;  %v572_v8 = vmax.f32 %v1936_v4, 0.0  ;;  %v730_v54 = vpop.f32.mrf.mxu1 }
 0x159   :  { %v1938_v5 = vpop.eup %1937  ;;  %1798 = vmatmul.mubr.bf16.gmra.mxu0 %v581_v46 }
 0x15a   :  { %v1940_v6 = vpop.eup %1939  ;;  %v575_v10 = vmax.f32 %v1938_v5, 0.0  ;;  %1820 = vmatpush3.bf16.msra.mxu1 %v1910_v20  ;;  %v1768_v61 = vpop.f32.mrf.mxu1 }
 0x15b   :  { %v1942_v7 = vpop.eup %1941  ;;  %v574_v12 = vmax.f32 %v1940_v6, 0.0  ;;  %1863 = vmatprep.subr.mxu1 %v2359_v21 }
 0x15c   :  { %v573_v9 = vmax.f32 %v1942_v7, 0.0  ;;  %v733_v4 = vpop.f32.mrf.mxu1 }
 0x15d   :  { %v583_v13 = vpack.c.bf16 %v575_v10, %v574_v12 }
 0x15e   :  { %v582_v11 = vpack.c.bf16 %v573_v9, %v572_v8  ;;  %v1771_v9 = vpop.f32.mrf.mxu1 }
 0x160   :  { %1801 = vmatprep.mubr.bf16.mxu0 %v582_v11  ;;  %v746_v18 = vpop.f32.mrf.mxu1 }
 0x161   :  { %1802 = vmatmul.mubr.bf16.gmra.mxu0 %v583_v13 }
 0x162   :  { %1839 = vmatprep.mubr.msk.f32.mxu0 %vm1170_vm1, %v1153_v22 }
 0x169   :  { %1840 = vmatmul.mubr.msk.f32.vlgmr.msra.gmra.mxu0 %vm1170_vm1, %v1154_v23 }
 0x16a   :  { %1842 = vmatprep.mubr.msk.f32.mxu0 %vm1170_vm1, %v1155_v24 }
 0x16d   :  { %1843 = vmatmul.mubr.msk.f32.gmra.mxu0 %vm1170_vm1, %v1156_v25 }
 0x16e   :  { %1845 = vmatprep.mubr.msk.f32.mxu0 %vm1170_vm1, %v1157_v26 }
 0x171   :  { %1846 = vmatmul.mubr.msk.f32.gmra.mxu0 %vm1170_vm1, %v1158_v27 }
 0x172   :  { %1848 = vmatprep.mubr.msk.f32.mxu0 %vm1170_vm1, %v1159_v28  ;;  %v1772_v28 = vpop.f32.mrf.mxu1 }
 0x175   :  { %1849 = vmatmul.mubr.msk.f32.gmra.mxu0 %vm1170_vm1, %v1160_v29 }
 0x176   :  { %1851 = vmatprep.mubr.msk.f32.mxu0 %vm1170_vm1, %v1161_v30 }
 0x179   :  { %1852 = vmatmul.mubr.msk.f32.gmra.mxu0 %vm1170_vm1, %v1162_v31 }
 0x17a   :  { %1854 = vmatprep.mubr.msk.f32.mxu0 %vm1170_vm1, %v1163_v32 }
 0x17d   :  { %1855 = vmatmul.mubr.msk.f32.gmra.mxu0 %vm1170_vm1, %v1164_v33 }
 0x209   :  { %v1791_v42 = vpop.f32.mrf.mxu0 }
 0x20a   :  { %v852_v43 = vadd.f32 %v1791_v42, %v1759_v34  ;;  %v749_v42 = vpop.f32.mrf.mxu1 }
 0x20b   :  { %v843_v45 = vpop.f32.mrf.mxu0 }
 0x20c   :  { %v844_v48 = vadd.f32 %v843_v45, %v698_v35  ;;  %v915_v49 = vadd.f32 %v2415_v44, %v852_v43 }
 0x20d   :  { %v1792_v50 = vpop.f32.mrf.mxu0 }
 0x20e   :  { %v855_v51 = vadd.f32 %v1792_v50, %v1760_v36  ;;  %v913_v52 = vadd.f32 %v2415_v44, %v844_v48  ;;  %1943 = vtanh.f32 %v915_v49 }
 0x20f   :  { %v846_v53 = vpop.f32.mrf.mxu0 }
 0x210   :  { %v916_v55 = vadd.f32 %v2415_v44, %v855_v51  ;;  %v847_v56 = vadd.f32 %v846_v53, %v701_v37 }
 0x211   :  { %v1795_v57 = vpop.f32.mrf.mxu0 }
 0x212   :  { %1945 = vtanh.f32 %v916_v55  ;;  %v914_v58 = vadd.f32 %v2415_v44, %v847_v56  ;;  %v868_v59 = vadd.f32 %v1795_v57, %v1763_v38 }
 0x213   :  { %1947 = vtanh.f32 %v913_v52  ;;  %v859_v60 = vpop.f32.mrf.mxu0 }
 0x214   :  { %1949 = vtanh.f32 %v914_v58  ;;  %v860_v62 = vadd.f32 %v859_v60, %v714_v39  ;;  %v919_v2 = vadd.f32 %v2415_v44, %v868_v59 }
 0x215   :  { %v1796_v63 = vpop.f32.mrf.mxu0 }
 0x216   :  { %v917_v0 = vadd.f32 %v2415_v44, %v860_v62  ;;  %v871_v1 = vadd.f32 %v1796_v63, %v1764_v40 }
 0x217   :  { %v862_v3 = vpop.f32.mrf.mxu0 }
 0x218   :  { %v920_v46 = vadd.f32 %v2415_v44, %v871_v1  ;;  %v863_v5 = vadd.f32 %v862_v3, %v717_v41  ;;  %1951 = vtanh.f32 %v917_v0 }
 0x219   :  { %v1799_v6 = vpop.f32.mrf.mxu0 }
 0x21a   :  { %1953 = vtanh.f32 %v920_v46  ;;  %v918_v7 = vadd.f32 %v2415_v44, %v863_v5  ;;  %v884_v8 = vadd.f32 %v1799_v6, %v1767_v47 }
 0x21b   :  { %1955 = vtanh.f32 %v919_v2  ;;  %v875_v10 = vpop.f32.mrf.mxu0  ;;  %v1944_v13 = vpop.eup %1943 }
 0x21c   :  { %1957 = vtanh.f32 %v918_v7  ;;  %v876_v11 = vadd.f32 %v875_v10, %v730_v54  ;;  %v923_v17 = vadd.f32 %v2415_v44, %v884_v8  ;;  %v947_v33 = vmax.f32 %v1944_v13, 0.0  ;;  %v1167_v13 = vld [vmem:[%s2681_s3 + $0x70] sm:$0xff] }
 0x21d   :  { %v1800_v12 = vpop.f32.mrf.mxu0 }
 0x21e   :  { %v921_v14 = vadd.f32 %v2415_v44, %v876_v11  ;;  %v887_v15 = vadd.f32 %v1800_v12, %v1768_v61  ;;  %v1165_v11 = vld [vmem:[%s2681_s3 + $0x60] sm:$0xff]  ;;  %v1166_v12 = vld [vmem:[%s2681_s3 + $0x68] sm:$0xff] }
 0x21f   :  { %v1946_v16 = vpop.eup %1945  ;;  %v878_v19 = vpop.f32.mrf.mxu0 }
 0x220   :  { %v1948_v20 = vpop.eup %1947  ;;  %v924_v22 = vadd.f32 %v2415_v44, %v887_v15  ;;  %v879_v23 = vadd.f32 %v878_v19, %v733_v4  ;;  %1959 = vtanh.f32 %v921_v14  ;;  %v948_v26 = vmax.f32 %v1946_v16, 0.0  ;;  %v1168_v14 = vld [vmem:[%s2681_s3 + $0x78] sm:$0xff] }
 0x221   :  { %v1950_v24 = vpop.eup %1949  ;;  %v1803_v25 = vpop.f32.mrf.mxu0  ;;  %v945_v31 = vmax.f32 %v1948_v20, 0.0 }
 0x222   :  { %1961 = vtanh.f32 %v924_v22  ;;  %v922_v27 = vadd.f32 %v2415_v44, %v879_v23  ;;  %v900_v29 = vadd.f32 %v1803_v25, %v1771_v9  ;;  %v946_v32 = vmax.f32 %v1950_v24, 0.0 }
 0x223   :  { %1963 = vtanh.f32 %v923_v17  ;;  %v891_v30 = vpop.f32.mrf.mxu0  ;;  %v962_v38 = vpack.c.bf16 %v948_v26, %v947_v33 }
 0x224   :  { %1965 = vtanh.f32 %v922_v27  ;;  %v892_v34 = vadd.f32 %v891_v30, %v746_v18  ;;  %v961_v36 = vpack.c.bf16 %v946_v32, %v945_v31  ;;  %v927_v43 = vadd.f32 %v2415_v44, %v900_v29  ;;  %v2455_v18 = vld [vmem:[%s2690_s12] ss:$0 sm:$0xff] }
 0x225   :  { %v1804_v35 = vpop.f32.mrf.mxu0  ;;  %v1952_v37 = vpop.eup %1951 }
 0x226   :  { %v925_v39 = vadd.f32 %v2415_v44, %v892_v34  ;;  %v903_v40 = vadd.f32 %v1804_v35, %v1772_v28  ;;  %1821 = vmatprep.mubr.bf16.mxu1 %v961_v36  ;;  %v949_v51 = vmax.f32 %v1952_v37, 0.0 }
 0x227   :  { %v1954_v41 = vpop.eup %1953  ;;  %v894_v45 = vpop.f32.mrf.mxu0  ;;  %1822 = vmatmul.mubr.bf16.vlgmr.msra.gmra.mxu1 %v962_v38 }
 0x228   :  { %v1956_v47 = vpop.eup %1955  ;;  %v928_v48 = vadd.f32 %v2415_v44, %v903_v40  ;;  %v895_v49 = vadd.f32 %v894_v45, %v749_v42  ;;  %1967 = vtanh.f32 %v925_v39  ;;  %1864 = vmatpush3.msra.mxu1 %v2359_v21  ;;  %v952_v54 = vmax.f32 %v1954_v41, 0.0 }
 0x229   :  { %v1958_v50 = vpop.eup %1957  ;;  %v951_v56 = vmax.f32 %v1956_v47, 0.0  ;;  %v2450_v15 = vpop.f32.mrf.mxu0 }
 0x22a   :  { %1969 = vtanh.f32 %v928_v48  ;;  %v926_v52 = vadd.f32 %v2415_v44, %v895_v49  ;;  %v950_v53 = vmax.f32 %v1958_v50, 0.0 }
 0x22b   :  { %1971 = vtanh.f32 %v927_v43  ;;  %v964_v58 = vpack.c.bf16 %v952_v54, %v951_v56  ;;  %v1285_v16 = vpop.f32.mrf.mxu0  ;;  %v2476_v43 = vld [vmem:[%s2691_s13] ss:$0 sm:$0xff] }
 0x22c   :  { %1973 = vtanh.f32 %v926_v52  ;;  %v963_v55 = vpack.c.bf16 %v950_v53, %v949_v51 }
 0x22d   :  { %v1960_v57 = vpop.eup %1959  ;;  %v1844_v17 = vpop.f32.mrf.mxu0 }
 0x22e   :  { %1825 = vmatprep.mubr.bf16.mxu1 %v963_v55  ;;  %v953_v62 = vmax.f32 %v1960_v57, 0.0 }
 0x22f   :  { %v1962_v59 = vpop.eup %1961  ;;  %1826 = vmatmul.mubr.bf16.gmra.mxu1 %v964_v58  ;;  %v1295_v19 = vpop.f32.mrf.mxu0 }
 0x230   :  { %v1964_v60 = vpop.eup %1963  ;;  %v956_v0 = vmax.f32 %v1962_v59, 0.0 }
 0x231   :  { %v1966_v61 = vpop.eup %1965  ;;  %v955_v1 = vmax.f32 %v1964_v60, 0.0  ;;  %v2458_v24 = vpop.f32.mrf.mxu0 }
 0x232   :  { %v954_v63 = vmax.f32 %v1966_v61, 0.0 }
 0x233   :  { %v966_v44 = vpack.c.bf16 %v956_v0, %v955_v1  ;;  %v2462_v29 = vpop.f32.mrf.mxu0 }
 0x234   :  { %v965_v21 = vpack.c.bf16 %v954_v63, %v953_v62 }
 0x235   :  { %v1968_v2 = vpop.eup %1967  ;;  %v2466_v34 = vpop.f32.mrf.mxu0 }
 0x236   :  { %1829 = vmatprep.mubr.bf16.mxu1 %v965_v21  ;;  %v957_v5 = vmax.f32 %v1968_v2, 0.0 }
 0x237   :  { %v1970_v3 = vpop.eup %1969  ;;  %1830 = vmatmul.mubr.bf16.gmra.mxu1 %v966_v44  ;;  %v1315_v39 = vpop.f32.mrf.mxu0 }
 0x238   :  { %v1972_v4 = vpop.eup %1971  ;;  %v960_v7 = vmax.f32 %v1970_v3, 0.0 }
 0x239   :  { %v1974_v46 = vpop.eup %1973  ;;  %v959_v9 = vmax.f32 %v1972_v4, 0.0  ;;  %v2482_v50 = vpop.f32.mrf.mxu0 }
 0x23a   :  { %v958_v6 = vmax.f32 %v1974_v46, 0.0 }
 0x23b   :  { %v968_v10 = vpack.c.bf16 %v960_v7, %v959_v9  ;;  %v2494_v62 = vpop.f32.mrf.mxu0 }
 0x23c   :  { %v967_v8 = vpack.c.bf16 %v958_v6, %v957_v5 }
 0x23e   :  { %1833 = vmatprep.mubr.bf16.mxu1 %v967_v8  ;;  %v1856_v8 = vpop.f32.mrf.mxu0 }
 0x23f   :  { %1834 = vmatmul.mubr.bf16.gmra.mxu1 %v968_v10 }
 0x240   :  { %1857 = vmatprep.mubr.msk.f32.mxu1 %vm1170_vm1, %v1165_v11 }
 0x247   :  { %1858 = vmatmul.mubr.msk.f32.vlgmr.msra.gmra.mxu1 %vm1170_vm1, %v1166_v12 }
 0x248   :  { %1860 = vmatprep.mubr.msk.f32.mxu1 %vm1170_vm1, %v1167_v13 }
 0x24b   :  { %1861 = vmatmul.mubr.msk.f32.gmra.mxu1 %vm1170_vm1, %v1168_v14 }
 0x2e7   :  { %v1823_v20 = vpop.f32.mrf.mxu1 }
 0x2e8   :  { %v1083_v22 = vadd.f32 %v1823_v20, %v2455_v18  ;;  %v1335_v20 = vpop.f32.mrf.mxu0 }
 0x2e9   :  { %v1074_v23 = vpop.f32.mrf.mxu1 }
 0x2ea   :  { %1975 = vtanh.f32 %v1083_v22  ;;  %v1075_v25 = vadd.f32 %v2455_v18, %v1074_v23 }
 0x2eb   :  { %v1824_v26 = vpop.f32.mrf.mxu1 }
 0x2ec   :  { %1977 = vtanh.f32 %v1075_v25  ;;  %v1086_v27 = vadd.f32 %v1824_v26, %v2455_v18 }
 0x2ed   :  { %v1077_v28 = vpop.f32.mrf.mxu1 }
 0x2ee   :  { %1979 = vtanh.f32 %v1086_v27  ;;  %v1078_v30 = vadd.f32 %v2455_v18, %v1077_v28 }
 0x2ef   :  { %v1827_v31 = vpop.f32.mrf.mxu1 }
 0x2f0   :  { %1981 = vtanh.f32 %v1078_v30  ;;  %v1099_v32 = vadd.f32 %v1827_v31, %v2455_v18 }
 0x2f1   :  { %v1090_v33 = vpop.f32.mrf.mxu1 }
 0x2f2   :  { %1983 = vtanh.f32 %v1099_v32  ;;  %v1091_v35 = vadd.f32 %v2455_v18, %v1090_v33 }
 0x2f3   :  { %v1828_v36 = vpop.f32.mrf.mxu1 }
 0x2f4   :  { %1985 = vtanh.f32 %v1091_v35  ;;  %v1102_v37 = vadd.f32 %v1828_v36, %v2455_v18 }
 0x2f5   :  { %v1093_v38 = vpop.f32.mrf.mxu1 }
 0x2f6   :  { %1987 = vtanh.f32 %v1102_v37  ;;  %v1094_v40 = vadd.f32 %v2455_v18, %v1093_v38 }
 0x2f7   :  { %v2471_v41 = vpop.eup %1975  ;;  %v1831_v42 = vpop.f32.mrf.mxu1 }
 0x2f8   :  { %1989 = vtanh.f32 %v1094_v40  ;;  %v1115_v45 = vadd.f32 %v1831_v42, %v2455_v18  ;;  %v1366_v47 = vsub.f32 %v1295_v19, %v2471_v41 }
 0x2f9   :  { %v2480_v48 = vpop.eup %1977  ;;  %v1106_v49 = vpop.f32.mrf.mxu1 }
 0x2fa   :  { %v1364_v51 = vsub.f32 %v1285_v16, %v2480_v48  ;;  %1991 = vtanh.f32 %v1115_v45  ;;  %v1107_v52 = vadd.f32 %v2455_v18, %v1106_v49  ;;  %v1389_v53 = vmul.f32 %v2476_v43, %v1366_v47 }
 0x2fb   :  { %v2487_v54 = vpop.eup %1979  ;;  %v1832_v55 = vpop.f32.mrf.mxu1 }
 0x2fc   :  { %v1367_v56 = vsub.f32 %v1844_v17, %v2487_v54  ;;  %1993 = vtanh.f32 %v1107_v52  ;;  %v1118_v57 = vadd.f32 %v1832_v55, %v2455_v18  ;;  %v1406_v58 = vmul.f32 %v1389_v53, %v1389_v53 }
 0x2fd   :  { %v2491_v59 = vpop.eup %1981  ;;  %v1109_v60 = vpop.f32.mrf.mxu1  ;;  %v1387_v61 = vmul.f32 %v2476_v43, %v1364_v51 }
 0x2fe   :  { %v1365_v63 = vsub.f32 %v2450_v15, %v2491_v59  ;;  %1995 = vtanh.f32 %v1118_v57  ;;  %v1110_v0 = vadd.f32 %v2455_v18, %v1109_v60  ;;  %1424 = vadd.xlane.f32.xlu1 %v1406_v58  ;;  %v1390_v21 = vmul.f32 %v2476_v43, %v1367_v56 }
 0x2ff   :  { %v2500_v1 = vpop.eup %1983  ;;  %v1835_v2 = vpop.f32.mrf.mxu1  ;;  %v1404_v44 = vmul.f32 %v1387_v61, %v1387_v61 }
 0x300   :  { %1997 = vtanh.f32 %v1110_v0  ;;  %v1131_v3 = vadd.f32 %v1835_v2, %v2455_v18  ;;  %v1370_v4 = vsub.f32 %v1315_v39, %v2500_v1  ;;  %v1407_v46 = vmul.f32 %v1390_v21, %v1390_v21 }
 0x301   :  { %v2504_v5 = vpop.eup %1985  ;;  %1420 = vadd.xlane.f32.xlu0 %v1404_v44  ;;  %v1122_v6 = vpop.f32.mrf.mxu1  ;;  %v1388_v7 = vmul.f32 %v2476_v43, %v1365_v63 }
 0x302   :  { %v1123_v9 = vadd.f32 %v2455_v18, %v1122_v6  ;;  %1426 = vadd.xlane.f32.xlu1 %v1407_v46  ;;  %v1368_v11 = vsub.f32 %v2462_v29, %v2504_v5  ;;  %1999 = vtanh.f32 %v1131_v3  ;;  %v1393_v14 = vmul.f32 %v2476_v43, %v1370_v4 }
 0x303   :  { %v2508_v10 = vpop.eup %1987  ;;  %v1836_v12 = vpop.f32.mrf.mxu1  ;;  %v1405_v13 = vmul.f32 %v1388_v7, %v1388_v7 }
 0x304   :  { %v1371_v15 = vsub.f32 %v2466_v34, %v2508_v10  ;;  %2001 = vtanh.f32 %v1123_v9  ;;  %v1134_v16 = vadd.f32 %v1836_v12, %v2455_v18  ;;  %v1410_v27 = vmul.f32 %v1393_v14, %v1393_v14 }
 0x305   :  { %v2516_v17 = vpop.eup %1989  ;;  %1422 = vadd.xlane.f32.xlu0 %v1405_v13  ;;  %v1125_v19 = vpop.f32.mrf.mxu1  ;;  %v1391_v29 = vmul.f32 %v2476_v43, %v1368_v11  ;;  %v2563_v11 = vstv %s2692_s14 }
 0x306   :  { %v1369_v22 = vsub.f32 %v2458_v24, %v2516_v17  ;;  %2003 = vtanh.f32 %v1134_v16  ;;  %v1126_v23 = vadd.f32 %v2455_v18, %v1125_v19  ;;  %v1394_v25 = vmul.f32 %v2476_v43, %v1371_v15 }
 0x307   :  { %v2522_v26 = vpop.eup %1991  ;;  %v1859_v28 = vpop.f32.mrf.mxu1  ;;  %v1408_v35 = vmul.f32 %v1391_v29, %v1391_v29 }
 0x308   :  { %2005 = vtanh.f32 %v1126_v23  ;;  %v1374_v30 = vsub.f32 %v1335_v20, %v2522_v26  ;;  %v1411_v31 = vmul.f32 %v1394_v25, %v1394_v25  ;;  %v1392_v32 = vmul.f32 %v2476_v43, %v1369_v22 }
 0x309   :  { %v2527_v33 = vpop.eup %1993  ;;  %1432 = vadd.xlane.f32.xlu0 %v1410_v27  ;;  %v1345_v24 = vpop.f32.mrf.mxu1 }
 0x30a   :  { %1434 = vadd.xlane.f32.xlu1 %v1411_v31  ;;  %v1372_v34 = vsub.f32 %v2494_v62, %v2527_v33  ;;  %v1397_v36 = vmul.f32 %v2476_v43, %v1374_v30  ;;  %v1409_v39 = vmul.f32 %v1392_v32, %v1392_v32 }
 0x30b   :  { %v2529_v18 = vpop.eup %1995  ;;  %v1862_v38 = vpop.f32.mrf.mxu1 }
 0x30c   :  { %v1375_v37 = vsub.f32 %v1856_v8, %v2529_v18  ;;  %v1414_v47 = vmul.f32 %v1397_v36, %v1397_v36  ;;  %v1395_v49 = vmul.f32 %v2476_v43, %v1372_v34  ;;  %v1485_v8 = vlaneseq }
 0x30d   :  { %v2535_v40 = vpop.eup %1997  ;;  %1428 = vadd.xlane.f32.xlu0 %v1408_v35  ;;  %v1355_v52 = vpop.f32.mrf.mxu1 }
 0x30e   :  { %v1373_v42 = vsub.f32 %v2482_v50, %v2535_v40  ;;  %1430 = vadd.xlane.f32.xlu1 %v1409_v39  ;;  %v1398_v45 = vmul.f32 %v2476_v43, %v1375_v37  ;;  %v1412_v60 = vmul.f32 %v1395_v49, %v1395_v49  ;;  %v2558_v9 = vand.u32 127, %v1485_v8 }
 0x30f   :  { %v2541_v51 = vpop.eup %1999 }
 0x310   :  { %v1415_v53 = vmul.f32 %v1398_v45, %v1398_v45  ;;  %v1396_v55 = vmul.f32 %v2476_v43, %v1373_v42  ;;  %v1378_v50 = vsub.f32 %v1355_v52, %v2541_v51  ;;  %vm1487_vm2 = vcmp.eq.s32.totalorder %v2558_v9, 8 }
 0x311   :  { %v2544_v56 = vpop.eup %2001  ;;  %1440 = vadd.xlane.f32.xlu0 %v1414_v47 }
 0x312   :  { %v1376_v57 = vsub.f32 %v1345_v24, %v2544_v56  ;;  %1442 = vadd.xlane.f32.xlu1 %v1415_v53  ;;  %v1413_v61 = vmul.f32 %v1396_v55, %v1396_v55  ;;  %v1401_v44 = vmul.f32 %v2476_v43, %v1378_v50 }
 0x313   :  { %v2547_v58 = vpop.eup %2003 }
 0x314   :  { %v1399_v62 = vmul.f32 %v2476_v43, %v1376_v57  ;;  %v1379_v21 = vsub.f32 %v1862_v38, %v2547_v58  ;;  %v1418_v6 = vmul.f32 %v1401_v44, %v1401_v44 }
 0x315   :  { %v2551_v63 = vpop.eup %2005  ;;  %1436 = vadd.xlane.f32.xlu0 %v1412_v60 }
 0x316   :  { %v1377_v0 = vsub.f32 %v1859_v28, %v2551_v63  ;;  %1438 = vadd.xlane.f32.xlu1 %v1413_v61  ;;  %v1416_v2 = vmul.f32 %v1399_v62, %v1399_v62  ;;  %v1402_v46 = vmul.f32 %v2476_v43, %v1379_v21 }
 0x318   :  { %v1400_v3 = vmul.f32 %v2476_v43, %v1377_v0  ;;  %v1419_v7 = vmul.f32 %v1402_v46, %v1402_v46 }
 0x319   :  { %1444 = vadd.xlane.f32.xlu0 %v1416_v2 }
 0x31a   :  { %v1417_v4 = vmul.f32 %v1400_v3, %v1400_v3 }
 0x31c   :  { %1446 = vadd.xlane.f32.xlu1 %v1417_v4 }
 0x31d   :  { %1448 = vadd.xlane.f32.xlu0 %v1418_v6 }
 0x320   :  { %1450 = vadd.xlane.f32.xlu1 %v1419_v7 }
 0x387   :  { %v1425_v12 = vpop.xlane.xlu1 %1424 }
 0x388   :  { %v1454_v13 = vmul.f32 0.5, %v1425_v12 }
 0x38a   :  { %v1471_v14 = vsub.f32 %v2563_v11, %v1454_v13  ;;  %v1421_v43 = vpop.xlane.xlu0 %1420 }
 0x38b   :  { %v1452_v15 = vmul.f32 0.5, %v1421_v43  ;;  %v1427_v16 = vpop.xlane.xlu1 %1426 }
 0x38c   :  { %v1490_v19 = vsel %vm1487_vm2, %v1471_v14, %v2471_v41  ;;  %v1455_v20 = vmul.f32 0.5, %v1427_v16 }
 0x38d   :  { %1506 = vst [vmem:[%s2693_s15 + $0x10] sm:$0xff] %v1490_v19  ;;  %v1469_v22 = vsub.f32 %v2563_v11, %v1452_v15 }
 0x38e   :  { %v1472_v23 = vsub.f32 %v2563_v11, %v1455_v20  ;;  %v1423_v25 = vpop.xlane.xlu0 %1422 }
 0x38f   :  { %v1488_v27 = vsel %vm1487_vm2, %v1469_v22, %v2480_v48  ;;  %v1453_v28 = vmul.f32 0.5, %v1423_v25 }
 0x390   :  { %1504 = vst [vmem:[%s2693_s15] sm:$0xff] %v1488_v27  ;;  %v1491_v41 = vsel %vm1487_vm2, %v1472_v23, %v2487_v54 }
 0x391   :  { %1507 = vst [vmem:[%s2693_s15 + $0x18] sm:$0xff] %v1491_v41  ;;  %v1470_v29 = vsub.f32 %v2563_v11, %v1453_v28 }
 0x392   :  { %v1433_v30 = vpop.xlane.xlu0 %1432 }
 0x393   :  { %v1489_v48 = vsel %vm1487_vm2, %v1470_v29, %v2491_v59  ;;  %v1458_v31 = vmul.f32 0.5, %v1433_v30  ;;  %v1435_v32 = vpop.xlane.xlu1 %1434 }
 0x394   :  { %1505 = vst [vmem:[%s2693_s15 + $0x8] sm:$0xff] %v1489_v48  ;;  %v1459_v24 = vmul.f32 0.5, %v1435_v32 }
 0x395   :  { %v1475_v54 = vsub.f32 %v2563_v11, %v1458_v31 }
 0x396   :  { %v1476_v34 = vsub.f32 %v2563_v11, %v1459_v24  ;;  %v1429_v35 = vpop.xlane.xlu0 %1428 }
 0x397   :  { %v1494_v36 = vsel %vm1487_vm2, %v1475_v54, %v2500_v1  ;;  %v1456_v37 = vmul.f32 0.5, %v1429_v35  ;;  %v1431_v38 = vpop.xlane.xlu1 %1430 }
 0x398   :  { %1510 = vst [vmem:[%s2693_s15 + $0x30] sm:$0xff] %v1494_v36  ;;  %v1495_v59 = vsel %vm1487_vm2, %v1476_v34, %v2508_v10  ;;  %v1457_v39 = vmul.f32 0.5, %v1431_v38 }
 0x399   :  { %1511 = vst [vmem:[%s2693_s15 + $0x38] sm:$0xff] %v1495_v59  ;;  %v1473_v42 = vsub.f32 %v2563_v11, %v1456_v37 }
 0x39a   :  { %v1474_v45 = vsub.f32 %v2563_v11, %v1457_v39  ;;  %v1441_v1 = vpop.xlane.xlu0 %1440 }
 0x39b   :  { %v1492_v47 = vsel %vm1487_vm2, %v1473_v42, %v2504_v5  ;;  %v1462_v49 = vmul.f32 0.5, %v1441_v1  ;;  %v1443_v52 = vpop.xlane.xlu1 %1442 }
 0x39c   :  { %1508 = vst [vmem:[%s2693_s15 + $0x20] sm:$0xff] %v1492_v47  ;;  %v1493_v10 = vsel %vm1487_vm2, %v1474_v45, %v2516_v17  ;;  %v1463_v53 = vmul.f32 0.5, %v1443_v52 }
 0x39d   :  { %1509 = vst [vmem:[%s2693_s15 + $0x28] sm:$0xff] %v1493_v10  ;;  %v1479_v55 = vsub.f32 %v2563_v11, %v1462_v49 }
 0x39e   :  { %v1480_v57 = vsub.f32 %v2563_v11, %v1463_v53  ;;  %v1437_v5 = vpop.xlane.xlu0 %1436 }
 0x39f   :  { %v1498_v50 = vsel %vm1487_vm2, %v1479_v55, %v2522_v26  ;;  %v1460_v60 = vmul.f32 0.5, %v1437_v5  ;;  %v1439_v61 = vpop.xlane.xlu1 %1438 }
 0x3a0   :  { %1514 = vst [vmem:[%s2693_s15 + $0x50] sm:$0xff] %v1498_v50  ;;  %v1499_v17 = vsel %vm1487_vm2, %v1480_v57, %v2529_v18  ;;  %v1461_v62 = vmul.f32 0.5, %v1439_v61 }
 0x3a1   :  { %1515 = vst [vmem:[%s2693_s15 + $0x58] sm:$0xff] %v1499_v17  ;;  %v1477_v0 = vsub.f32 %v2563_v11, %v1460_v60 }
 0x3a2   :  { %v1478_v21 = vsub.f32 %v2563_v11, %v1461_v62  ;;  %v1445_v26 = vpop.xlane.xlu0 %1444 }
 0x3a3   :  { %v1496_v2 = vsel %vm1487_vm2, %v1477_v0, %v2527_v33  ;;  %v1464_v44 = vmul.f32 0.5, %v1445_v26 }
 0x3a4   :  { %1512 = vst [vmem:[%s2693_s15 + $0x40] sm:$0xff] %v1496_v2  ;;  %v1497_v18 = vsel %vm1487_vm2, %v1478_v21, %v2535_v40 }
 0x3a5   :  { %1513 = vst [vmem:[%s2693_s15 + $0x48] sm:$0xff] %v1497_v18  ;;  %v1481_v3 = vsub.f32 %v2563_v11, %v1464_v44  ;;  %v1447_v4 = vpop.xlane.xlu1 %1446 }
 0x3a6   :  { %v1465_v46 = vmul.f32 0.5, %v1447_v4  ;;  %v1449_v6 = vpop.xlane.xlu0 %1448 }
 0x3a7   :  { %v1500_v33 = vsel %vm1487_vm2, %v1481_v3, %v2544_v56  ;;  %v1466_v7 = vmul.f32 0.5, %v1449_v6 }
 0x3a8   :  { %1516 = vst [vmem:[%s2693_s15 + $0x60] sm:$0xff] %v1500_v33  ;;  %v1482_v40 = vsub.f32 %v2563_v11, %v1465_v46 }
 0x3a9   :  { %v1483_v8 = vsub.f32 %v2563_v11, %v1466_v7  ;;  %v1451_v12 = vpop.xlane.xlu1 %1450 }
 0x3aa   :  { %v1501_v13 = vsel %vm1487_vm2, %v1482_v40, %v2551_v63  ;;  %v1467_v14 = vmul.f32 0.5, %v1451_v12 }
 0x3ab   :  { %1517 = vst [vmem:[%s2693_s15 + $0x68] sm:$0xff] %v1501_v13  ;;  %v1502_v56 = vsel %vm1487_vm2, %v1483_v8, %v2541_v51 }
 0x3ac   :  { %1518 = vst [vmem:[%s2693_s15 + $0x70] sm:$0xff] %v1502_v56  ;;  %v1484_v43 = vsub.f32 %v2563_v11, %v1467_v14 }
 0x3ae   :  { %v1503_v15 = vsel %vm1487_vm2, %v1484_v43, %v2547_v58 }
 0x3af   :  { %1519 = vst [vmem:[%s2693_s15 + $0x78] sm:$0xff] %v1503_v15 }
 0x3b0   :  { %1524 = vsyncpa [#allocation4], 1 }
 0x3b1   :  { %1525 = vsyncpa [#allocation6], 1 }
 0x3b2   :  { %1526 = vsyncpa [#allocation9], 1 }
 0x3b3   :  { %1527 = vsyncpa [#allocation12], 1 }

</bundles_post_ra>
